<compile_context>
chip_gen: v7x
topology: tpu7x:2x2x1
jax: 0.10.0
libtpu: 0.0.40
codegen_flags: <defaults>
</compile_context>

<pallas_src>
import math

import jax
import jax.numpy as jnp
import numpy as np
from jax.experimental import pallas as pl
from jax.experimental.pallas import tpu as pltpu

RATE = 0.1          # LeakyReLU negative slope == module's `rate`
BN_EPS = 1e-5


def _complex_mult_kernel(r_ref, i_ref,
                         wf_ref, bf_ref,       # fused bf16 [w1|w3] (BN folded), f32 [b1|b3]
                         w2_ref, b2_ref,       # real_linear2 (bf16 / f32)
                         w4_ref, b4_ref,       # imag_linear2 (bf16 / f32)
                         *out_refs):
    tm = r_ref.shape[0]
    half = wf_ref.shape[0]        # a1 // 2 (live K rows)
    hid = w2_ref.shape[0]         # a2 * 4

    # Only the low half of the last dim is ever read (masked upper half).
    r_low = r_ref[:, :half]                                  # f32 (tm, half)
    i_low = i_ref[:, :half]

    # Stack real/imag rows -> one first-layer matmul against [w1|w3].
    x = jnp.concatenate([r_low, i_low], axis=0).astype(jnp.bfloat16)   # (2*tm, half)

    h = jnp.dot(x, wf_ref[...], preferred_element_type=jnp.float32) + bf_ref[...]
    h = jnp.where(h >= 0, h, RATE * h)                       # LeakyReLU(0.1), f32
    hb = h.astype(jnp.bfloat16)

    # Second layer: column halves of h are the real / imag branch hiddens.
    F = jnp.dot(hb[:, :hid], w2_ref[...],
                preferred_element_type=jnp.float32) + b2_ref[...]      # (2*tm, a2)
    G = jnp.dot(hb[:, hid:], w4_ref[...],
                preferred_element_type=jnp.float32) + b4_ref[...]      # (2*tm, a2)

    # F[:tm] = real_branch(xr), F[tm:] = real_branch(xi)
    # G[:tm] = imag_branch(xr), G[tm:] = imag_branch(xi)
    fr = F[:tm] - G[tm:]
    fi = F[tm:] + G[:tm]

    # Residual r1/p1 is the masked input: nonzero only in columns [0, half),
    # so add it (f32) to the low-half output columns only — no full-width mask.
    out_r = jnp.concatenate([fr[:, :half] + r_low, fr[:, half:]], axis=-1)
    out_i = jnp.concatenate([fi[:, :half] + i_low, fi[:, half:]], axis=-1)

    if len(out_refs) == 2:
        # a2 % 128 == 0: two separate lane-dense planes.
        out_refs[0][...] = out_r
        out_refs[1][...] = out_i
    else:
        # a2 < 128 (or not lane-aligned): single fused lane-dense slab.
        out_refs[0][...] = jnp.concatenate([out_r, out_i], axis=-1)


def prepare_params(params):
    """One-time weight preparation (hoisted out of the per-call path).

    Folds the eval-mode BN scalar into the first-layer weights, keeps only the
    live (unmasked) a1//2 K-rows, concatenates the real/imag first layers, and
    casts the matmul weights to bf16 (f32 biases). Cache the result and reuse
    it across forward calls.
    """
    w1, b1, w2, b2, w3, b3, w4, b4 = params
    a1 = w1.shape[0]
    hid = w1.shape[1]
    a2 = w2.shape[1]
    half = a1 // 2

    bn_scale = 1.0 / math.sqrt(1.0 + BN_EPS)
    wf = (jnp.concatenate([w1[:half], w3[:half]], axis=1) * bn_scale
          ).astype(jnp.bfloat16)                              # (half, 2*hid)
    bf = jnp.concatenate([b1, b3], axis=1).astype(jnp.float32)  # (1, 2*hid)

    return dict(
        wf=wf, bf=bf,
        w2=w2.astype(jnp.bfloat16), b2=b2.astype(jnp.float32),
        w4=w4.astype(jnp.bfloat16), b4=b4.astype(jnp.float32),
        a1=a1, a2=a2, hid=hid, half=half,
    )


def _vmem_limit_bytes(tm, a1, a2, hid, half):
    """Rough scoped-VMEM budget: pipeline buffers + weights + headroom."""
    f32, bf16 = 4, 2
    io = 2 * (tm * a1 * f32) * 2 + (tm * 2 * a2 * f32) * 2        # r,i in + out, 2-buf
    w = ((half * 2 * hid + 2 * hid * a2) * bf16
         + (2 * hid + 2 * a2) * f32) * 2                          # weights (worst case 2-buf)
    tmp = (2 * tm) * (2 * hid) * f32 * 2                          # h (+ bf16 copy) headroom
    est = io + w + tmp + (8 << 20)
    return int(max(32 << 20, min(est, 120 << 20)))


def complex_multiplication_planes(real, imag, prepared, *, tm=512):
    """real/imag: [B, C, H, a1] float32. Returns (out_real, out_imag) float32
    planes of shape [B, C, H, a2] (no complex64 interleave pass)."""
    B, C, H, a1 = real.shape
    assert a1 == prepared["a1"]
    a2, hid, half = prepared["a2"], prepared["hid"], prepared["half"]
    assert a1 == a2, "residual add requires window_size1 == window_size2"

    M = B * C * H
    # NOTE: only columns [0, a1//2) are live; if the upstream FFT/mask stage
    # can emit just the low band (or a packed [r_low | i_low] layout), the
    # input DMA here could be halved. Not done here to avoid an extra XLA pass.
    r2 = real.reshape(M, a1)
    i2 = imag.reshape(M, a1)

    # Row tile: big by default, multiple of 8, and split so the grid has >= 2
    # steps whenever possible (v7x: shard rows across both TensorCores).
    tm = max(8, min(tm, M))
    tm = -(-tm // 8) * 8
    if pl.cdiv(M, tm) < 2 and M >= 16:
        tm = -(-((M + 1) // 2) // 8) * 8
    grid = (pl.cdiv(M, tm),)

    split_out = (a2 % 128 == 0)
    vmem_limit = _vmem_limit_bytes(tm, a1, a2, hid, half)

    def run(weight_single_buffered):
        if weight_single_buffered:
            # Weight blocks never change index -> single buffer is enough.
            def wspec(shape):
                return pl.BlockSpec(shape, lambda m: (0, 0),
                                    pipeline_mode=pl.Buffered(1))
        else:
            def wspec(shape):
                return pl.BlockSpec(shape, lambda m: (0, 0))

        row_spec = pl.BlockSpec((tm, a1), lambda m: (m, 0))
        in_specs = [
            row_spec, row_spec,
            wspec((half, 2 * hid)), wspec((1, 2 * hid)),
            wspec((hid, a2)), wspec((1, a2)),
            wspec((hid, a2)), wspec((1, a2)),
        ]
        if split_out:
            out_specs = (pl.BlockSpec((tm, a2), lambda m: (m, 0)),
                         pl.BlockSpec((tm, a2), lambda m: (m, 0)))
            out_shape = (jax.ShapeDtypeStruct((M, a2), jnp.float32),
                         jax.ShapeDtypeStruct((M, a2), jnp.float32))
        else:
            out_specs = pl.BlockSpec((tm, 2 * a2), lambda m: (m, 0))
            out_shape = jax.ShapeDtypeStruct((M, 2 * a2), jnp.float32)

        return pl.pallas_call(
            _complex_mult_kernel,
            grid=grid,
            in_specs=in_specs,
            out_specs=out_specs,
            out_shape=out_shape,
            compiler_params=pltpu.CompilerParams(
                dimension_semantics=("parallel",),
                vmem_limit_bytes=vmem_limit),
        )(r2, i2, prepared["wf"], prepared["bf"],
          prepared["w2"], prepared["b2"], prepared["w4"], prepared["b4"])

    if hasattr(pl, "Buffered"):
        try:
            out = run(True)
        except Exception:
            # Fallback if pipeline_mode=Buffered(1) is unsupported on this jax.
            out = run(False)
    else:
        out = run(False)

    if split_out:
        out_r, out_i = out
        return (out_r.reshape(B, C, H, a2), out_i.reshape(B, C, H, a2))
    # a2 < 128: fused lane-dense slab; split it here. (A consumer that accepts
    # the fused [real | imag] layout could skip this pass entirely.)
    out_r = out[:, :a2].reshape(B, C, H, a2)
    out_i = out[:, a2:].reshape(B, C, H, a2)
    return out_r, out_i


def complex_multiplication(real, imag, prepared, *, tm=512):
    """API-parity wrapper returning complex64 like the PyTorch module."""
    out_r, out_i = complex_multiplication_planes(real, imag, prepared, tm=tm)
    # TODO(synk): prefer the planes (or fused slab) downstream — building
    # complex64 here is an extra interleave pass over the output.
    return jax.lax.complex(out_r, out_i)


def init_params(key, window_size1, window_size2):
    """Deterministic Linear params (PyTorch-style uniform init), pre-transposed
    to [in, out] for x @ W; biases stored as [1, out]."""
    a1 = window_size1
    a2 = window_size2
    hid = a2 * 4

    def linear(kw, kb, fan_in, fan_out):
        bound = 1.0 / math.sqrt(fan_in)
        w = jax.random.uniform(kw, (fan_in, fan_out), jnp.float32, -bound, bound)
        b = jax.random.uniform(kb, (1, fan_out), jnp.float32, -bound, bound)
        return w, b

    ks = jax.random.split(key, 8)
    w1, b1 = linear(ks[0], ks[1], a1, hid)    # real_linear
    w2, b2 = linear(ks[2], ks[3], hid, a2)    # real_linear2
    w3, b3 = linear(ks[4], ks[5], a1, hid)    # imag_linear
    w4, b4 = linear(ks[6], ks[7], hid, a2)    # imag_linear2
    return (w1, b1, w2, b2, w3, b3, w4, b4)


def _reference(real, imag, params):
    """Pure-JAX f32 reference mirroring the PyTorch forward (eval mode)."""
    w1, b1, w2, b2, w3, b3, w4, b4 = params
    a1 = real.shape[-1]
    mask = (jnp.arange(a1) < a1 // 2).astype(real.dtype)
    r1 = real * mask
    p1 = imag * mask
    s = 1.0 / math.sqrt(1.0 + BN_EPS)
    xr, xi = r1 * s, p1 * s

    def branch(x, wa, ba, wb, bb):
        h = x @ wa + ba
        h = jnp.where(h >= 0, h, RATE * h)
        return h @ wb + bb

    out_r = r1 + branch(xr, w1, b1, w2, b2) - branch(xi, w3, b3, w4, b4)
    out_i = p1 + branch(xi, w1, b1, w2, b2) + branch(xr, w3, b3, w4, b4)
    return jax.lax.complex(out_r, out_i)


if __name__ == "__main__":
    key = jax.random.PRNGKey(0)
    k_param, k_real, k_imag = jax.random.split(key, 3)

    B, C, H = 2, 4, 8                 # batch, enc_in channels, "rows"
    window_size = 64                  # a1 == a2 (required by the residual add)
    params = init_params(k_param, window_size, window_size)
    prepared = prepare_params(params)     # one-time weight prep, reused per call

    real = jax.random.normal(k_real, (B, C, H, window_size), jnp.float32)
    imag = jax.random.normal(k_imag, (B, C, H, window_size), jnp.float32)

    out_r, out_i = complex_multiplication_planes(real, imag, prepared)
    out_r, out_i = jax.block_until_ready((out_r, out_i))

    ref = jax.block_until_ready(_reference(real, imag, params))
    # bf16 MXU operands -> looser tolerance than an all-f32 run (expected).
    np.testing.assert_allclose(np.asarray(out_r), np.asarray(ref.real),
                               rtol=2e-2, atol=2e-2)
    np.testing.assert_allclose(np.asarray(out_i), np.asarray(ref.imag),
                               rtol=2e-2, atol=2e-2)

    print("KERNEL_OK")
</pallas_src>

<mosaic_0001>
module attributes {stable_mosaic.version = 11 : i64} {
  func.func @_complex_mult_kernel(%arg0: i32, %arg1: memref<32x64xf32, #tpu.memory_space<vmem>>, %arg2: memref<32x64xf32, #tpu.memory_space<vmem>>, %arg3: memref<32x512xbf16, #tpu.memory_space<vmem>>, %arg4: memref<1x512xf32, #tpu.memory_space<vmem>>, %arg5: memref<256x64xbf16, #tpu.memory_space<vmem>>, %arg6: memref<1x64xf32, #tpu.memory_space<vmem>>, %arg7: memref<256x64xbf16, #tpu.memory_space<vmem>>, %arg8: memref<1x64xf32, #tpu.memory_space<vmem>>, %arg9: memref<32x128xf32, #tpu.memory_space<vmem>>) attributes {dimension_semantics = [#tpu.dimension_semantics<parallel>], iteration_bounds = array<i64: 2>, scalar_prefetch = 0 : i64, scratch_operands = 0 : i64, tpu.core_type = #tpu.core_type<tc>, window_params = [{transform_indices = @transform_0, window_bounds = array<i64: 32, 64>}, {transform_indices = @transform_1, window_bounds = array<i64: 32, 64>}, {pipeline_mode = #tpu.pipeline_mode<synchronous>, transform_indices = @transform_2, window_bounds = array<i64: 32, 512>}, {pipeline_mode = #tpu.pipeline_mode<synchronous>, transform_indices = @transform_3, window_bounds = array<i64: 1, 512>}, {pipeline_mode = #tpu.pipeline_mode<synchronous>, transform_indices = @transform_4, window_bounds = array<i64: 256, 64>}, {pipeline_mode = #tpu.pipeline_mode<synchronous>, transform_indices = @transform_5, window_bounds = array<i64: 1, 64>}, {pipeline_mode = #tpu.pipeline_mode<synchronous>, transform_indices = @transform_6, window_bounds = array<i64: 256, 64>}, {pipeline_mode = #tpu.pipeline_mode<synchronous>, transform_indices = @transform_7, window_bounds = array<i64: 1, 64>}, {transform_indices = @transform_8, window_bounds = array<i64: 32, 128>}]} {
    %c0 = arith.constant 0 : index
    %c0_0 = arith.constant 0 : index
    %0 = vector.load %arg1[%c0, %c0_0] : memref<32x64xf32, #tpu.memory_space<vmem>>, vector<32x32xf32>
    %c0_1 = arith.constant 0 : index
    %c0_2 = arith.constant 0 : index
    %1 = vector.load %arg2[%c0_1, %c0_2] : memref<32x64xf32, #tpu.memory_space<vmem>>, vector<32x32xf32>
    %2 = tpu.concatenate %0, %1 in 0 : vector<32x32xf32>, vector<32x32xf32> -> vector<64x32xf32>
    %3 = arith.truncf %2 : vector<64x32xf32> to vector<64x32xbf16>
    %c0_3 = arith.constant 0 : index
    %c0_4 = arith.constant 0 : index
    %4 = vector.load %arg3[%c0_3, %c0_4] : memref<32x512xbf16, #tpu.memory_space<vmem>>, vector<32x512xbf16>
    %cst = arith.constant dense<0.000000e+00> : vector<64x512xf32>
    %5 = tpu.matmul %3, %4, %cst {dimension_numbers = #tpu.dot_dimension_numbers<[1], [0], [0], [1], [0, 0, 1, 1], [], []>} : vector<64x32xbf16>, vector<32x512xbf16>, vector<64x512xf32> -> vector<64x512xf32>
    %c0_5 = arith.constant 0 : index
    %c0_6 = arith.constant 0 : index
    %6 = vector.load %arg4[%c0_5, %c0_6] : memref<1x512xf32, #tpu.memory_space<vmem>>, vector<1x512xf32>
    %7 = vector.broadcast %6 : vector<1x512xf32> to vector<64x512xf32>
    %8 = arith.addf %5, %7 : vector<64x512xf32>
    %cst_7 = arith.constant 0.000000e+00 : f32
    %9 = vector.broadcast %cst_7 : f32 to vector<64x512xf32>
    %10 = arith.cmpf oge, %8, %9 : vector<64x512xf32>
    %cst_8 = arith.constant 1.000000e-01 : f32
    %11 = vector.broadcast %cst_8 : f32 to vector<64x512xf32>
    %12 = arith.mulf %11, %8 : vector<64x512xf32>
    %13 = arith.select %10, %8, %12 : vector<64x512xi1>, vector<64x512xf32>
    %14 = arith.truncf %13 : vector<64x512xf32> to vector<64x512xbf16>
    %15 = vector.extract_strided_slice %14 {offsets = [0, 0], sizes = [64, 256], strides = [1, 1]} : vector<64x512xbf16> to vector<64x256xbf16>
    %c0_9 = arith.constant 0 : index
    %c0_10 = arith.constant 0 : index
    %16 = vector.load %arg5[%c0_9, %c0_10] : memref<256x64xbf16, #tpu.memory_space<vmem>>, vector<256x64xbf16>
    %cst_11 = arith.constant dense<0.000000e+00> : vector<64x64xf32>
    %17 = tpu.matmul %15, %16, %cst_11 {dimension_numbers = #tpu.dot_dimension_numbers<[1], [0], [0], [1], [0, 0, 1, 1], [], []>} : vector<64x256xbf16>, vector<256x64xbf16>, vector<64x64xf32> -> vector<64x64xf32>
    %c0_12 = arith.constant 0 : index
    %c0_13 = arith.constant 0 : index
    %18 = vector.load %arg6[%c0_12, %c0_13] : memref<1x64xf32, #tpu.memory_space<vmem>>, vector<1x64xf32>
    %19 = vector.broadcast %18 : vector<1x64xf32> to vector<64x64xf32>
    %20 = arith.addf %17, %19 : vector<64x64xf32>
    %21 = vector.extract_strided_slice %14 {offsets = [0, 256], sizes = [64, 256], strides = [1, 1]} : vector<64x512xbf16> to vector<64x256xbf16>
    %c0_14 = arith.constant 0 : index
    %c0_15 = arith.constant 0 : index
    %22 = vector.load %arg7[%c0_14, %c0_15] : memref<256x64xbf16, #tpu.memory_space<vmem>>, vector<256x64xbf16>
    %cst_16 = arith.constant dense<0.000000e+00> : vector<64x64xf32>
    %23 = tpu.matmul %21, %22, %cst_16 {dimension_numbers = #tpu.dot_dimension_numbers<[1], [0], [0], [1], [0, 0, 1, 1], [], []>} : vector<64x256xbf16>, vector<256x64xbf16>, vector<64x64xf32> -> vector<64x64xf32>
    %c0_17 = arith.constant 0 : index
    %c0_18 = arith.constant 0 : index
    %24 = vector.load %arg8[%c0_17, %c0_18] : memref<1x64xf32, #tpu.memory_space<vmem>>, vector<1x64xf32>
    %25 = vector.broadcast %24 : vector<1x64xf32> to vector<64x64xf32>
    %26 = arith.addf %23, %25 : vector<64x64xf32>
    %27 = vector.extract_strided_slice %20 {offsets = [0, 0], sizes = [32, 64], strides = [1, 1]} : vector<64x64xf32> to vector<32x64xf32>
    %28 = vector.extract_strided_slice %26 {offsets = [32, 0], sizes = [32, 64], strides = [1, 1]} : vector<64x64xf32> to vector<32x64xf32>
    %29 = arith.subf %27, %28 : vector<32x64xf32>
    %30 = vector.extract_strided_slice %20 {offsets = [32, 0], sizes = [32, 64], strides = [1, 1]} : vector<64x64xf32> to vector<32x64xf32>
    %31 = vector.extract_strided_slice %26 {offsets = [0, 0], sizes = [32, 64], strides = [1, 1]} : vector<64x64xf32> to vector<32x64xf32>
    %32 = arith.addf %30, %31 : vector<32x64xf32>
    %33 = vector.extract_strided_slice %29 {offsets = [0, 0], sizes = [32, 32], strides = [1, 1]} : vector<32x64xf32> to vector<32x32xf32>
    %34 = arith.addf %33, %0 : vector<32x32xf32>
    %35 = vector.extract_strided_slice %29 {offsets = [0, 32], sizes = [32, 32], strides = [1, 1]} : vector<32x64xf32> to vector<32x32xf32>
    %36 = tpu.concatenate %34, %35 in 1 : vector<32x32xf32>, vector<32x32xf32> -> vector<32x64xf32>
    %37 = vector.extract_strided_slice %32 {offsets = [0, 0], sizes = [32, 32], strides = [1, 1]} : vector<32x64xf32> to vector<32x32xf32>
    %38 = arith.addf %37, %1 : vector<32x32xf32>
    %39 = vector.extract_strided_slice %32 {offsets = [0, 32], sizes = [32, 32], strides = [1, 1]} : vector<32x64xf32> to vector<32x32xf32>
    %40 = tpu.concatenate %38, %39 in 1 : vector<32x32xf32>, vector<32x32xf32> -> vector<32x64xf32>
    %41 = tpu.concatenate %36, %40 in 1 : vector<32x64xf32>, vector<32x64xf32> -> vector<32x128xf32>
    %c0_19 = arith.constant 0 : index
    %c0_20 = arith.constant 0 : index
    %42 = vector.load %arg9[%c0_19, %c0_20] : memref<32x128xf32, #tpu.memory_space<vmem>>, vector<32x128xf32>
    tpu.vector_store %arg9[%c0_19, %c0_20], %41 {strides = array<i32>} : memref<32x128xf32, #tpu.memory_space<vmem>>, vector<32x128xf32>,
    return
  }
  func.func @transform_0(%arg0: i32) -> (i32, i32) {
    %c0_i32 = arith.constant 0 : i32
    %c0_i32_0 = arith.constant 0 : i32
    return %arg0, %c0_i32 : i32, i32
  }
  func.func @transform_1(%arg0: i32) -> (i32, i32) {
    %c0_i32 = arith.constant 0 : i32
    %c0_i32_0 = arith.constant 0 : i32
    return %arg0, %c0_i32 : i32, i32
  }
  func.func @transform_2(%arg0: i32) -> (i32, i32) {
    %c0_i32 = arith.constant 0 : i32
    %c0_i32_0 = arith.constant 0 : i32
    %c0_i32_1 = arith.constant 0 : i32
    return %c0_i32, %c0_i32_0 : i32, i32
  }
  func.func @transform_3(%arg0: i32) -> (i32, i32) {
    %c0_i32 = arith.constant 0 : i32
    %c0_i32_0 = arith.constant 0 : i32
    %c0_i32_1 = arith.constant 0 : i32
    return %c0_i32, %c0_i32_0 : i32, i32
  }
  func.func @transform_4(%arg0: i32) -> (i32, i32) {
    %c0_i32 = arith.constant 0 : i32
    %c0_i32_0 = arith.constant 0 : i32
    %c0_i32_1 = arith.constant 0 : i32
    return %c0_i32, %c0_i32_0 : i32, i32
  }
  func.func @transform_5(%arg0: i32) -> (i32, i32) {
    %c0_i32 = arith.constant 0 : i32
    %c0_i32_0 = arith.constant 0 : i32
    %c0_i32_1 = arith.constant 0 : i32
    return %c0_i32, %c0_i32_0 : i32, i32
  }
  func.func @transform_6(%arg0: i32) -> (i32, i32) {
    %c0_i32 = arith.constant 0 : i32
    %c0_i32_0 = arith.constant 0 : i32
    %c0_i32_1 = arith.constant 0 : i32
    return %c0_i32, %c0_i32_0 : i32, i32
  }
  func.func @transform_7(%arg0: i32) -> (i32, i32) {
    %c0_i32 = arith.constant 0 : i32
    %c0_i32_0 = arith.constant 0 : i32
    %c0_i32_1 = arith.constant 0 : i32
    return %c0_i32, %c0_i32_0 : i32, i32
  }
  func.func @transform_8(%arg0: i32) -> (i32, i32) {
    %c0_i32 = arith.constant 0 : i32
    %c0_i32_0 = arith.constant 0 : i32
    return %arg0, %c0_i32 : i32, i32
  }
}

module attributes {stable_mosaic.version = 11 : i64} {
  func.func @_complex_mult_kernel(%arg0: i32, %arg1: memref<32x64xf32, #tpu.memory_space<vmem>>, %arg2: memref<32x64xf32, #tpu.memory_space<vmem>>, %arg3: memref<32x512xbf16, #tpu.memory_space<vmem>>, %arg4: memref<1x512xf32, #tpu.memory_space<vmem>>, %arg5: memref<256x64xbf16, #tpu.memory_space<vmem>>, %arg6: memref<1x64xf32, #tpu.memory_space<vmem>>, %arg7: memref<256x64xbf16, #tpu.memory_space<vmem>>, %arg8: memref<1x64xf32, #tpu.memory_space<vmem>>, %arg9: memref<32x128xf32, #tpu.memory_space<vmem>>) attributes {dimension_semantics = [#tpu.dimension_semantics<parallel>], iteration_bounds = array<i64: 2>, scalar_prefetch = 0 : i64, scratch_operands = 0 : i64, tpu.core_type = #tpu.core_type<tc>, window_params = [{transform_indices = @transform_0, window_bounds = array<i64: 32, 64>}, {transform_indices = @transform_1, window_bounds = array<i64: 32, 64>}, {pipeline_mode = #tpu.pipeline_mode<synchronous>, transform_indices = @transform_2, window_bounds = array<i64: 32, 512>}, {pipeline_mode = #tpu.pipeline_mode<synchronous>, transform_indices = @transform_3, window_bounds = array<i64: 1, 512>}, {pipeline_mode = #tpu.pipeline_mode<synchronous>, transform_indices = @transform_4, window_bounds = array<i64: 256, 64>}, {pipeline_mode = #tpu.pipeline_mode<synchronous>, transform_indices = @transform_5, window_bounds = array<i64: 1, 64>}, {pipeline_mode = #tpu.pipeline_mode<synchronous>, transform_indices = @transform_6, window_bounds = array<i64: 256, 64>}, {pipeline_mode = #tpu.pipeline_mode<synchronous>, transform_indices = @transform_7, window_bounds = array<i64: 1, 64>}, {transform_indices = @transform_8, window_bounds = array<i64: 32, 128>}]} {
    %c0 = arith.constant 0 : index
    %c0_0 = arith.constant 0 : index
    %0 = vector.load %arg1[%c0, %c0_0] : memref<32x64xf32, #tpu.memory_space<vmem>>, vector<32x32xf32>
    %c0_1 = arith.constant 0 : index
    %c0_2 = arith.constant 0 : index
    %1 = vector.load %arg2[%c0_1, %c0_2] : memref<32x64xf32, #tpu.memory_space<vmem>>, vector<32x32xf32>
    %2 = tpu.concatenate %0, %1 in 0 : vector<32x32xf32>, vector<32x32xf32> -> vector<64x32xf32>
    %3 = arith.truncf %2 : vector<64x32xf32> to vector<64x32xbf16>
    %c0_3 = arith.constant 0 : index
    %c0_4 = arith.constant 0 : index
    %4 = vector.load %arg3[%c0_3, %c0_4] : memref<32x512xbf16, #tpu.memory_space<vmem>>, vector<32x512xbf16>
    %cst = arith.constant dense<0.000000e+00> : vector<64x512xf32>
    %5 = tpu.matmul %3, %4, %cst {dimension_numbers = #tpu.dot_dimension_numbers<[1], [0], [0], [1], [0, 0, 1, 1], [], []>} : vector<64x32xbf16>, vector<32x512xbf16>, vector<64x512xf32> -> vector<64x512xf32>
    %c0_5 = arith.constant 0 : index
    %c0_6 = arith.constant 0 : index
    %6 = vector.load %arg4[%c0_5, %c0_6] : memref<1x512xf32, #tpu.memory_space<vmem>>, vector<1x512xf32>
    %7 = vector.broadcast %6 : vector<1x512xf32> to vector<64x512xf32>
    %8 = arith.addf %5, %7 : vector<64x512xf32>
    %cst_7 = arith.constant 0.000000e+00 : f32
    %9 = vector.broadcast %cst_7 : f32 to vector<64x512xf32>
    %10 = arith.cmpf oge, %8, %9 : vector<64x512xf32>
    %cst_8 = arith.constant 1.000000e-01 : f32
    %11 = vector.broadcast %cst_8 : f32 to vector<64x512xf32>
    %12 = arith.mulf %11, %8 : vector<64x512xf32>
    %13 = arith.select %10, %8, %12 : vector<64x512xi1>, vector<64x512xf32>
    %14 = arith.truncf %13 : vector<64x512xf32> to vector<64x512xbf16>
    %15 = vector.extract_strided_slice %14 {offsets = [0, 0], sizes = [64, 256], strides = [1, 1]} : vector<64x512xbf16> to vector<64x256xbf16>
    %c0_9 = arith.constant 0 : index
    %c0_10 = arith.constant 0 : index
    %16 = vector.load %arg5[%c0_9, %c0_10] : memref<256x64xbf16, #tpu.memory_space<vmem>>, vector<256x64xbf16>
    %cst_11 = arith.constant dense<0.000000e+00> : vector<64x64xf32>
    %17 = tpu.matmul %15, %16, %cst_11 {dimension_numbers = #tpu.dot_dimension_numbers<[1], [0], [0], [1], [0, 0, 1, 1], [], []>} : vector<64x256xbf16>, vector<256x64xbf16>, vector<64x64xf32> -> vector<64x64xf32>
    %c0_12 = arith.constant 0 : index
    %c0_13 = arith.constant 0 : index
    %18 = vector.load %arg6[%c0_12, %c0_13] : memref<1x64xf32, #tpu.memory_space<vmem>>, vector<1x64xf32>
    %19 = vector.broadcast %18 : vector<1x64xf32> to vector<64x64xf32>
    %20 = arith.addf %17, %19 : vector<64x64xf32>
    %21 = vector.extract_strided_slice %14 {offsets = [0, 256], sizes = [64, 256], strides = [1, 1]} : vector<64x512xbf16> to vector<64x256xbf16>
    %c0_14 = arith.constant 0 : index
    %c0_15 = arith.constant 0 : index
    %22 = vector.load %arg7[%c0_14, %c0_15] : memref<256x64xbf16, #tpu.memory_space<vmem>>, vector<256x64xbf16>
    %cst_16 = arith.constant dense<0.000000e+00> : vector<64x64xf32>
    %23 = tpu.matmul %21, %22, %cst_16 {dimension_numbers = #tpu.dot_dimension_numbers<[1], [0], [0], [1], [0, 0, 1, 1], [], []>} : vector<64x256xbf16>, vector<256x64xbf16>, vector<64x64xf32> -> vector<64x64xf32>
    %c0_17 = arith.constant 0 : index
    %c0_18 = arith.constant 0 : index
    %24 = vector.load %arg8[%c0_17, %c0_18] : memref<1x64xf32, #tpu.memory_space<vmem>>, vector<1x64xf32>
    %25 = vector.broadcast %24 : vector<1x64xf32> to vector<64x64xf32>
    %26 = arith.addf %23, %25 : vector<64x64xf32>
    %27 = vector.extract_strided_slice %20 {offsets = [0, 0], sizes = [32, 64], strides = [1, 1]} : vector<64x64xf32> to vector<32x64xf32>
    %28 = vector.extract_strided_slice %26 {offsets = [32, 0], sizes = [32, 64], strides = [1, 1]} : vector<64x64xf32> to vector<32x64xf32>
    %29 = arith.subf %27, %28 : vector<32x64xf32>
    %30 = vector.extract_strided_slice %20 {offsets = [32, 0], sizes = [32, 64], strides = [1, 1]} : vector<64x64xf32> to vector<32x64xf32>
    %31 = vector.extract_strided_slice %26 {offsets = [0, 0], sizes = [32, 64], strides = [1, 1]} : vector<64x64xf32> to vector<32x64xf32>
    %32 = arith.addf %30, %31 : vector<32x64xf32>
    %33 = vector.extract_strided_slice %29 {offsets = [0, 0], sizes = [32, 32], strides = [1, 1]} : vector<32x64xf32> to vector<32x32xf32>
    %34 = arith.addf %33, %0 : vector<32x32xf32>
    %35 = vector.extract_strided_slice %29 {offsets = [0, 32], sizes = [32, 32], strides = [1, 1]} : vector<32x64xf32> to vector<32x32xf32>
    %36 = tpu.concatenate %34, %35 in 1 : vector<32x32xf32>, vector<32x32xf32> -> vector<32x64xf32>
    %37 = vector.extract_strided_slice %32 {offsets = [0, 0], sizes = [32, 32], strides = [1, 1]} : vector<32x64xf32> to vector<32x32xf32>
    %38 = arith.addf %37, %1 : vector<32x32xf32>
    %39 = vector.extract_strided_slice %32 {offsets = [0, 32], sizes = [32, 32], strides = [1, 1]} : vector<32x64xf32> to vector<32x32xf32>
    %40 = tpu.concatenate %38, %39 in 1 : vector<32x32xf32>, vector<32x32xf32> -> vector<32x64xf32>
    %41 = tpu.concatenate %36, %40 in 1 : vector<32x64xf32>, vector<32x64xf32> -> vector<32x128xf32>
    %c0_19 = arith.constant 0 : index
    %c0_20 = arith.constant 0 : index
    %42 = vector.load %arg9[%c0_19, %c0_20] : memref<32x128xf32, #tpu.memory_space<vmem>>, vector<32x128xf32>
    tpu.vector_store %arg9[%c0_19, %c0_20], %41 {strides = array<i32>} : memref<32x128xf32, #tpu.memory_space<vmem>>, vector<32x128xf32>,
    return
  }
  func.func @transform_0(%arg0: i32) -> (i32, i32) {
    %c0_i32 = arith.constant 0 : i32
    %c0_i32_0 = arith.constant 0 : i32
    return %arg0, %c0_i32 : i32, i32
  }
  func.func @transform_1(%arg0: i32) -> (i32, i32) {
    %c0_i32 = arith.constant 0 : i32
    %c0_i32_0 = arith.constant 0 : i32
    return %arg0, %c0_i32 : i32, i32
  }
  func.func @transform_2(%arg0: i32) -> (i32, i32) {
    %c0_i32 = arith.constant 0 : i32
    %c0_i32_0 = arith.constant 0 : i32
    %c0_i32_1 = arith.constant 0 : i32
    return %c0_i32, %c0_i32_0 : i32, i32
  }
  func.func @transform_3(%arg0: i32) -> (i32, i32) {
    %c0_i32 = arith.constant 0 : i32
    %c0_i32_0 = arith.constant 0 : i32
    %c0_i32_1 = arith.constant 0 : i32
    return %c0_i32, %c0_i32_0 : i32, i32
  }
  func.func @transform_4(%arg0: i32) -> (i32, i32) {
    %c0_i32 = arith.constant 0 : i32
    %c0_i32_0 = arith.constant 0 : i32
    %c0_i32_1 = arith.constant 0 : i32
    return %c0_i32, %c0_i32_0 : i32, i32
  }
  func.func @transform_5(%arg0: i32) -> (i32, i32) {
    %c0_i32 = arith.constant 0 : i32
    %c0_i32_0 = arith.constant 0 : i32
    %c0_i32_1 = arith.constant 0 : i32
    return %c0_i32, %c0_i32_0 : i32, i32
  }
  func.func @transform_6(%arg0: i32) -> (i32, i32) {
    %c0_i32 = arith.constant 0 : i32
    %c0_i32_0 = arith.constant 0 : i32
    %c0_i32_1 = arith.constant 0 : i32
    return %c0_i32, %c0_i32_0 : i32, i32
  }
  func.func @transform_7(%arg0: i32) -> (i32, i32) {
    %c0_i32 = arith.constant 0 : i32
    %c0_i32_0 = arith.constant 0 : i32
    %c0_i32_1 = arith.constant 0 : i32
    return %c0_i32, %c0_i32_0 : i32, i32
  }
  func.func @transform_8(%arg0: i32) -> (i32, i32) {
    %c0_i32 = arith.constant 0 : i32
    %c0_i32_0 = arith.constant 0 : i32
    return %arg0, %c0_i32 : i32, i32
  }
}

</mosaic_0001>

<bundles_post_ra>
// kernel: tpu_custom_call.1
= control target key start
LH: loop header
LB: loop body
LE: loop exit
PB: predicated region body
PF: predicated region fallthrough
CT: control target
= control target key end

     0   :  { %13 = vsyncpa [#allocation3], 0  ;;  %s1942_s0 = inlined_call_operand.vmem [shape: f32[64,64], index: 0, kind: input, shape index: {}]   ;;  %s1943_s1 = inlined_call_operand.vmem [shape: f32[64,64], index: 1, kind: input, shape index: {}]   ;;  %s1944_s2 = inlined_call_operand.vmem [shape: bf16[32,512], index: 2, kind: input, shape index: {}]   ;;  %s1945_s3 = inlined_call_operand.vmem [shape: f32[1,512], index: 3, kind: input, shape index: {}]   ;;  %s1946_s4 = inlined_call_operand.vmem [shape: bf16[256,64], index: 4, kind: input, shape index: {}]   ;;  %s1947_s5 = inlined_call_operand.vmem [shape: f32[1,64], index: 5, kind: input, shape index: {}]   ;;  %s1948_s6 = inlined_call_operand.vmem [shape: bf16[256,64], index: 6, kind: input, shape index: {}]   ;;  %s1949_s7 = inlined_call_operand.vmem [shape: f32[1,64], index: 7, kind: input, shape index: {}]   ;;  %s1950_s8 = inlined_call_operand.hbm [shape: f32[64,128], index: 8, kind: output, shape index: {}]  }
   0x1   :  { %15 = vsyncpa [#allocation3 + $0x1], 0  ;;  %s1566_s27 = smov 0   ;;  %s1568_s28 = smov 0  }
   0x2   :  { %s1570_s29 = smov 0   ;;  %s1572_s30 = smov 0  }
   0x3 LB: > { %s1587_s9 = sadd.s32 4294967295, %s1514_s30   ;;  %s1220_s10 = sadd.s32 4294967294, %s1514_s30   ;;  %s1514_s30 = sphi %s1572_s30, %s1956_s30   ;;  %s1510_s29 = sphi %s1570_s29, %s1955_s29   ;;  %s1506_s28 = sphi %s1568_s28, %s1954_s28   ;;  %s1502_s27 = sphi %s1566_s27, %s1953_s27  }
   0x4   : > { %s1591_s11 = sadd.s32 1, %s1514_s30   ;;  %s206_s12 = sadd.s32 1, %s1510_s29 }
   0x5   : > { %s203_s13 = ssub.s32 %s1514_s30, %s1591_s11  ;;  %p216_p0 = scmp.ne.s32.totalorder %s1510_s29, %s1506_s28 }
   0x6   : > { %p204_p1 = scmp.eq.s32.totalorder %s203_s13, 0  ;;  %p217_p2 = scmp.eq.s32.totalorder %s1587_s9, 1 }
   0x7   : > { %p222_p3 = scmp.ne.s32.totalorder %s1506_s28, %s1502_s27  ;;  %p223_p4 = scmp.eq.s32.totalorder %s1220_s10, 1 }
   0x8   : > { %s1602_s14 = scalar_select %p204_p1, %s1510_s29, %s206_s12  }
   0x9   : > { %p1604_p5 = por %p217_p2, %p216_p0  ;;  %p1608_p6 = por %p223_p4, %p222_p3 }
   0xa   : > { %p1223_p7 = scmp.ge.s32.totalorder %s1514_s30, 1  ;;  %p277_p8 = scmp.lt.s32.totalorder %s1514_s30, 3 }
   0xc   : > { %p278_p9 = pnand %p1223_p7, %p277_p8 }
   0xd   : > { %v1408_v0 = vld [vmem:[%s1944_s2 + $0x4] ss:$16 sps:$4 sm:$0xff] (!%p278_p9)   ;;  %s1225_s19 = sshll.u32 (!%p278_p9), %s1587_s9, 2  ;;  %v1410_v1 = vld [vmem:[%s1944_s2 + $0xc] ss:$16 sps:$4 sm:$0xff] (!%p278_p9)   ;;  %v1516_v2 = vmov (!%p278_p9), 0   ;;  %v352_v53 = vlaneseq (!%p278_p9) }
   0xe   : > { %281 = sbr.rel (%p278_p9) target bundleno = 637 (0x27d), region = 52  ;;  %457 = vmatprep.mubr.bf16.mxu0 (!%p278_p9), %v1516_v2  ;;  %530 = vmatprep.mubr.bf16.mxu1 (!%p278_p9), %v1516_v2  ;;  %p317_p10 = scmp.lt.s32.totalorder (!%p278_p9), %s1225_s19, 7  ;;  %v1412_v3 = vld [vmem:[%s1944_s2] ss:$16 sps:$4 sm:$0xff] (!%p278_p9)   ;;  %v1413_v4 = vld [vmem:[%s1944_s2 + $0x8] ss:$16 sps:$4 sm:$0xff] (!%p278_p9)  }
   0xf   : > { %425 = vmatprep.subr.bf16.mxu0 (!%p278_p9), %v1408_v0  ;;  %498 = vmatprep.subr.bf16.mxu1 (!%p278_p9), %v1410_v1  ;;  %v1414_v5 = vld [vmem:[%s1944_s2 + $0x24] ss:$16 sps:$4 sm:$0xff] (!%p278_p9)   ;;  %v1416_v6 = vld [vmem:[%s1944_s2 + $0x2c] ss:$16 sps:$4 sm:$0xff] (!%p278_p9)   ;;  %v1418_v7 = vld [vmem:[%s1944_s2 + $0x20] ss:$16 sps:$4 sm:$0xff] (!%p278_p9)  }
  0x10   : > { %426 = vmatpush1.bf16.msra.mxu0 (!%p278_p9), %v1412_v3  ;;  %499 = vmatpush1.bf16.msra.mxu1 (!%p278_p9), %v1413_v4  ;;  %v1419_v8 = vld [vmem:[%s1944_s2 + $0x28] ss:$16 sps:$4 sm:$0xff] (!%p278_p9)   ;;  %v1420_v9 = vld [vmem:[%s1946_s4 + $0x40] sm:$0xff] (!%p278_p9)   ;;  %vm412_vm0 = vcmask (!%p278_p9), 261120   ;;  %v1428_v23 = vld [vmem:[%s1946_s4 + $0x50] sm:$0xff] (!%p278_p9)   ;;  %v353_v54 = vshrl.u32 (!%p278_p9), %v352_v53, 7 }
  0x11   : > { %427 = vmatprep.subr.bf16.mxu0 (!%p278_p9), %v1414_v5  ;;  %500 = vmatprep.subr.bf16.mxu1 (!%p278_p9), %v1416_v6  ;;  %v1421_v13 = vld [vmem:[%s1946_s4] sm:$0xff] (!%p278_p9)   ;;  %v1424_v18 = vld [vmem:[%s1946_s4 + $0x48] sm:$0xff] (!%p278_p9)   ;;  %v1429_v24 = vld [vmem:[%s1946_s4 + $0x10] sm:$0xff] (!%p278_p9)   ;;  %s1517_s24 = smov (!%p278_p9), 64   ;;  %s1518_s20 = smov (!%p278_p9), [#allocation2]  }
  0x12   : > { %v1422_v16 = vld [vmem:[%s1948_s6 + $0x40] sm:$0xff] (!%p278_p9)   ;;  %v1425_v19 = vld [vmem:[%s1946_s4 + $0x8] sm:$0xff] (!%p278_p9)   ;;  %v1430_v27 = vld [vmem:[%s1948_s6 + $0x50] sm:$0xff] (!%p278_p9)   ;;  %v354_v55 = vsub.s32 (!%p278_p9), 0, %v353_v54  ;;  %v362_v56 = vsub.s32 (!%p278_p9), 2, %v353_v54  ;;  %v358_v58 = vsub.s32 (!%p278_p9), 1, %v353_v54 }
  0x13   : > { %v1423_v17 = vld [vmem:[%s1948_s6] sm:$0xff] (!%p278_p9)   ;;  %v1426_v20 = vld [vmem:[%s1948_s6 + $0x48] sm:$0xff] (!%p278_p9)   ;;  %v1431_v28 = vld [vmem:[%s1948_s6 + $0x10] sm:$0xff] (!%p278_p9)   ;;  %v366_v59 = vsub.s32 (!%p278_p9), 3, %v353_v54  ;;  %s1456_s21 = sshll.u32 (!%p278_p9), %s1518_s20, 4  ;;  %s1457_s21 = int_to_ptr.vmem [resolvable:$false] %s1456_s21 }
  0x14   : > { %428 = vmatpush1.bf16.msra.mxu0 (!%p278_p9), %v1418_v7  ;;  %501 = vmatpush1.bf16.msra.mxu1 (!%p278_p9), %v1419_v8  ;;  %v1427_v22 = vld [vmem:[%s1948_s6 + $0x8] sm:$0xff] (!%p278_p9)   ;;  %v1432_v29 = vld [vmem:[%s1946_s4 + $0x58] sm:$0xff] (!%p278_p9)   ;;  %v1436_v34 = vld [vmem:[%s1946_s4 + $0x60] sm:$0xff] (!%p278_p9)   ;;  %s1458_s23 = scalar_lea.vmem (!%p278_p9), %s1457_s21, 1024 }
  0x15   : > { %s1958_s19 = smov (!%p317_p10, %s1225_s19), 7  ;;  %1285 = vmatprep.subr.bf16.mxu0 %v1420_v9  ;;  %1325 = vmatprep.subr.bf16.mxu1 %v1422_v16  ;;  %v1433_v30 = vld [vmem:[%s1946_s4 + $0x18] sm:$0xff]   ;;  %v1437_v35 = vld [vmem:[%s1946_s4 + $0x20] sm:$0xff]   ;;  %v1440_v40 = vld [vmem:[%s1946_s4 + $0x68] sm:$0xff]  }
  0x16   : > { %s1226_s22 = sshll.u32 %s1958_s19, 3  ;;  %v1434_v31 = vld [vmem:[%s1948_s6 + $0x58] sm:$0xff]   ;;  %v1438_v38 = vld [vmem:[%s1948_s6 + $0x60] sm:$0xff]   ;;  %v1442_v42 = vld [vmem:[%s1948_s6 + $0x68] sm:$0xff]   ;;  %s1284_s19 = sshll.u32 %s1587_s9, 9 }
  0x17   : > { %s320_s10 = scalar_lea.vmem %s1942_s0, %s1226_s22  ;;  %s326_s13 = scalar_lea.vmem %s1943_s1, %s1226_s22  ;;  %v1435_v33 = vld [vmem:[%s1948_s6 + $0x18] sm:$0xff]   ;;  %v1439_v39 = vld [vmem:[%s1948_s6 + $0x20] sm:$0xff]   ;;  %v1441_v43 = vld [vmem:[%s1946_s4 + $0x28] sm:$0xff]  }
  0x18   : > { %v1650_v10 = vld [vmem:[%s320_s10] sm:$0xff]  ;;  %v1652_v11 = vld [vmem:[%s320_s10 + $0x8] sm:$0xff]  ;;  %v1659_v14 = vld [vmem:[%s320_s10 + $0x10] sm:$0xff]  ;;  %s313_s22 = sand.u32 1, %s1506_s28   ;;  %s1898_s18 = scalar_lea.hbm %s1950_s8, %s1284_s19 }
  0x19   : > { %v338_v12 = vpack.c.bf16 %v1652_v11, %v1650_v10  ;;  %v1661_v15 = vld [vmem:[%s320_s10 + $0x18] sm:$0xff]  ;;  %v1696_v25 = vld [vmem:[%s326_s13] sm:$0xff]  ;;  %v1698_v26 = vld [vmem:[%s326_s13 + $0x8] sm:$0xff]  ;;  %s1224_s25 = sshll.u32 %s313_s22, 5 }
  0x1a   : > { %v339_v21 = vpack.c.bf16 %v1661_v15, %v1659_v14  ;;  %v340_v32 = vpack.c.bf16 %v1698_v26, %v1696_v25  ;;  %v1730_v36 = vld [vmem:[%s326_s13 + $0x10] sm:$0xff]  ;;  %v1732_v37 = vld [vmem:[%s326_s13 + $0x18] sm:$0xff]  ;;  %v1443_v44 = vld [vmem:[%s1948_s6 + $0x28] sm:$0xff]   ;;  %s315_s26 = scalar_lea.vmem [#allocation2], %s1224_s25  ;;  %s1901_s13 = scalar_lea.sflag [#allocation3], %s313_s22 }
  0x1b   : > { %1237 = vmatmul.mubr.msk.bf16.vlgmr.msra.gmra.mrb[0].mxu0 %vm412_vm0, %v338_v12  ;;  %1241 = vmatmul.mubr.msk.bf16.vlgmr.msra.gmra.mrb[0].mxu1 %vm412_vm0, %v338_v12  ;;  %v341_v41 = vpack.c.bf16 %v1732_v37, %v1730_v36  ;;  %v1444_v45 = vld [vmem:[%s1946_s4 + $0x70] sm:$0xff]   ;;  %v1448_v49 = vld [vmem:[%s1946_s4 + $0x78] sm:$0xff]   ;;  %v350_v57 = vld [vmem:[%s1945_s3] sm:$0xf]  ;;  %s1146_s10 = sshll.u32 %s315_s26, 4  ;;  %s1892_s10 = int_to_ptr.vmem [resolvable:$true] %s1146_s10 }
  0x1c   : > { %467 = vmatprep.mubr.bf16.mxu0 %v1516_v2  ;;  %540 = vmatprep.mubr.bf16.mxu1 %v1516_v2  ;;  %v1446_v46 = vld [vmem:[%s1948_s6 + $0x70] sm:$0xff]   ;;  %v1450_v50 = vld [vmem:[%s1948_s6 + $0x78] sm:$0xff]   ;;  %v1787_v60 = vrot.slane %v350_v57, %v354_v55  ;;  %v1789_v61 = vrot.slane %v350_v57, %v362_v56  ;;  %v1791_v62 = vrot.slane %v350_v57, %v358_v58  ;;  %s1452_s9 = scalar_lea.vmem %s1892_s10, 512  ;;  %p1459_p0 = scmp.lt.s32.totalorder %s1892_s10, %s1457_s21 }
  0x1d   : > { %1286 = vmatpush3.bf16.msra.mxu0 %v1421_v13  ;;  %1326 = vmatpush3.bf16.msra.mxu1 %v1423_v17  ;;  %v1445_v47 = vld [vmem:[%s1946_s4 + $0x30] sm:$0xff]   ;;  %v1449_v51 = vld [vmem:[%s1946_s4 + $0x38] sm:$0xff]   ;;  %v1793_v63 = vrot.slane %v350_v57, %v366_v59  ;;  %p1453_p11 = scmp.ne.s32.totalorder %s1892_s10, %s1452_s9  ;;  %p1460_p1 = scmp.lt.s32.totalorder %s1458_s23, %s1452_s9 }
  0x1e   : > { %1287 = vmatprep.subr.bf16.mxu0 %v1424_v18  ;;  %1327 = vmatprep.subr.bf16.mxu1 %v1426_v20  ;;  %v1447_v48 = vld [vmem:[%s1948_s6 + $0x30] sm:$0xff]   ;;  %v1451_v52 = vld [vmem:[%s1948_s6 + $0x38] sm:$0xff]  }
  0x1f   : > { %p1454_p12 = pnand %p1453_p11, %p1604_p5  ;;  %p1461_p2 = por %p1460_p1, %p1459_p0 }
  0x21   : > { %1288 = vmatpush3.bf16.msra.mxu0 %v1425_v19  ;;  %1328 = vmatpush3.bf16.msra.mxu1 %v1427_v22  ;;  %p1455_p13 = pneg %p1454_p12 }
  0x22   : > { %1289 = vmatprep.subr.bf16.mxu0 %v1428_v23  ;;  %1329 = vmatprep.subr.bf16.mxu1 %v1430_v27 }
  0x23   : > { %1238 = vmatmul.mubr.msk.bf16.gmra.mrb[4].mxu0 %vm412_vm0, %v339_v21  ;;  %1242 = vmatmul.mubr.msk.bf16.gmra.mrb[4].mxu1 %vm412_vm0, %v339_v21  ;;  %p1462_p3 = pnand %p1461_p2, %p1455_p13 }
  0x24   : > { %477 = vmatprep.mubr.bf16.mxu0 %v1516_v2  ;;  %550 = vmatprep.mubr.bf16.mxu1 %v1516_v2 }
  0x25   : > { %1290 = vmatpush3.bf16.msra.mxu0 %v1429_v24  ;;  %1330 = vmatpush3.bf16.msra.mxu1 %v1431_v28 }
  0x26   : > { %1291 = vmatprep.subr.bf16.mxu0 %v1432_v29  ;;  %1331 = vmatprep.subr.bf16.mxu1 %v1434_v31 }
  0x29   : > { %1292 = vmatpush3.bf16.msra.mxu0 %v1433_v30  ;;  %1332 = vmatpush3.bf16.msra.mxu1 %v1435_v33 }
  0x2a   : > { %1293 = vmatprep.subr.bf16.mxu0 %v1436_v34  ;;  %1333 = vmatprep.subr.bf16.mxu1 %v1438_v38 }
  0x2b   : > { %1239 = vmatmul.mubr.msk.bf16.gmra.mrb[8].mxu0 %vm412_vm0, %v340_v32  ;;  %1243 = vmatmul.mubr.msk.bf16.gmra.mrb[8].mxu1 %vm412_vm0, %v340_v32 }
  0x2c   : > { %487 = vmatprep.mubr.bf16.mxu0 %v1516_v2  ;;  %560 = vmatprep.mubr.bf16.mxu1 %v1516_v2 }
  0x2d   : > { %1294 = vmatpush3.bf16.msra.mxu0 %v1437_v35  ;;  %1334 = vmatpush3.bf16.msra.mxu1 %v1439_v39 }
  0x2e   : > { %1295 = vmatprep.subr.bf16.mxu0 %v1440_v40  ;;  %1335 = vmatprep.subr.bf16.mxu1 %v1442_v42 }
  0x31   : > { %1296 = vmatpush3.bf16.msra.mxu0 %v1441_v43  ;;  %1336 = vmatpush3.bf16.msra.mxu1 %v1443_v44 }
  0x32   : > { %1297 = vmatprep.subr.bf16.mxu0 %v1444_v45  ;;  %1337 = vmatprep.subr.bf16.mxu1 %v1446_v46 }
  0x33   : > { %1240 = vmatmul.mubr.msk.bf16.gmra.mrb[12].mxu0 %vm412_vm0, %v341_v41  ;;  %1244 = vmatmul.mubr.msk.bf16.gmra.mrb[12].mxu1 %vm412_vm0, %v341_v41 }
  0x35   : > { %1298 = vmatpush3.bf16.msra.mxu0 %v1445_v47  ;;  %1338 = vmatpush3.bf16.msra.mxu1 %v1447_v48 }
  0x36   : > { %1299 = vmatprep.subr.bf16.mxu0 %v1448_v49  ;;  %1339 = vmatprep.subr.bf16.mxu1 %v1450_v50 }
  0x39   : > { %1300 = vmatpush3.bf16.msra.mxu0 %v1449_v51  ;;  %1340 = vmatpush3.bf16.msra.mxu1 %v1451_v52 }
  0xee   : > { %v459_v0 = vpop.f32.mrb[0].mxu0  ;;  %v532_v1 = vpop.f32.mrb[0].mxu1 }
  0xef   : > { %v460_v2 = vadd.f32 %v459_v0, %v1787_v60  ;;  %v533_v3 = vadd.f32 %v532_v1, %v1789_v61  ;;  %v461_v4 = vpop.f32.mrb[1].mxu0  ;;  %v534_v5 = vpop.f32.mrb[1].mxu1 }
  0xf0   : > { %v462_v6 = vadd.f32 %v461_v4, %v1791_v62  ;;  %v535_v7 = vadd.f32 %v534_v5, %v1793_v63  ;;  %v463_v8 = vpop.f32.mrb[2].mxu0  ;;  %v536_v9 = vpop.f32.mrb[2].mxu1 }
  0xf1   : > { %vm571_vm1 = vcmp.ge.f32.partialorder %v460_v2, 0.0  ;;  %v603_v12 = vmul.f32 0.1, %v460_v2  ;;  %vm573_vm2 = vcmp.ge.f32.partialorder %v533_v3, 0.0  ;;  %v605_v13 = vmul.f32 0.1, %v533_v3 }
  0xf2   : > { %vm572_vm3 = vcmp.ge.f32.partialorder %v462_v6, 0.0  ;;  %v604_v16 = vmul.f32 0.1, %v462_v6  ;;  %vm574_vm4 = vcmp.ge.f32.partialorder %v535_v7, 0.0  ;;  %v606_v17 = vmul.f32 0.1, %v535_v7 }
  0xf3   : > { %v464_v18 = vadd.f32 %v463_v8, %v1787_v60  ;;  %v537_v19 = vadd.f32 %v536_v9, %v1789_v61  ;;  %v465_v20 = vpop.f32.mrb[3].mxu0  ;;  %v538_v21 = vpop.f32.mrb[3].mxu1  ;;  %v635_v22 = vsel %vm571_vm1, %v460_v2, %v603_v12  ;;  %v637_v23 = vsel %vm573_vm2, %v533_v3, %v605_v13 }
  0xf4   : > { %v466_v24 = vadd.f32 %v465_v20, %v1791_v62  ;;  %v539_v27 = vadd.f32 %v538_v21, %v1793_v63  ;;  %v636_v38 = vsel %vm572_vm3, %v462_v6, %v604_v16  ;;  %v638_v39 = vsel %vm574_vm4, %v535_v7, %v606_v17 }
  0xf5   : > { %vm575_vm5 = vcmp.ge.f32.partialorder %v464_v18, 0.0  ;;  %v607_v28 = vmul.f32 0.1, %v464_v18  ;;  %vm577_vm6 = vcmp.ge.f32.partialorder %v537_v19, 0.0  ;;  %v609_v29 = vmul.f32 0.1, %v537_v19 }
  0xf6   : > { %vm576_vm7 = vcmp.ge.f32.partialorder %v466_v24, 0.0  ;;  %v608_v30 = vmul.f32 0.1, %v466_v24  ;;  %vm578_vm8 = vcmp.ge.f32.partialorder %v539_v27, 0.0  ;;  %v610_v31 = vmul.f32 0.1, %v539_v27 }
  0xf7   : > { %v639_v32 = vsel %vm575_vm5, %v464_v18, %v607_v28  ;;  %v641_v33 = vsel %vm577_vm6, %v537_v19, %v609_v29  ;;  %v469_v34 = vpop.f32.mrb[4].mxu0  ;;  %v542_v35 = vpop.f32.mrb[4].mxu1 }
  0xf8   : > { %v667_v40 = vpack.c.bf16 %v639_v32, %v635_v22  ;;  %v669_v41 = vpack.c.bf16 %v641_v33, %v637_v23  ;;  %v470_v42 = vadd.f32 %v469_v34, %v1787_v60  ;;  %v543_v43 = vadd.f32 %v542_v35, %v1789_v61  ;;  %v471_v44 = vpop.f32.mrb[5].mxu0  ;;  %v544_v45 = vpop.f32.mrb[5].mxu1 }
  0xf9   : > { %v472_v46 = vadd.f32 %v471_v44, %v1791_v62  ;;  %v545_v47 = vadd.f32 %v544_v45, %v1793_v63  ;;  %v473_v48 = vpop.f32.mrb[6].mxu0  ;;  %v546_v49 = vpop.f32.mrb[6].mxu1  ;;  %v640_v50 = vsel %vm576_vm7, %v466_v24, %v608_v30  ;;  %v642_v51 = vsel %vm578_vm8, %v539_v27, %v610_v31 }
  0xfa   : > { %vm579_vm9 = vcmp.ge.f32.partialorder %v470_v42, 0.0  ;;  %v611_v52 = vmul.f32 0.1, %v470_v42  ;;  %vm581_vm10 = vcmp.ge.f32.partialorder %v543_v43, 0.0  ;;  %v613_v53 = vmul.f32 0.1, %v543_v43 }
  0xfb   : > { %vm580_vm11 = vcmp.ge.f32.partialorder %v472_v46, 0.0  ;;  %v612_v54 = vmul.f32 0.1, %v472_v46  ;;  %vm582_vm12 = vcmp.ge.f32.partialorder %v545_v47, 0.0  ;;  %v614_v55 = vmul.f32 0.1, %v545_v47 }
  0xfc   : > { %v474_v56 = vadd.f32 %v473_v48, %v1787_v60  ;;  %v547_v57 = vadd.f32 %v546_v49, %v1789_v61  ;;  %v475_v58 = vpop.f32.mrb[7].mxu0  ;;  %v548_v59 = vpop.f32.mrb[7].mxu1  ;;  %v668_v0 = vpack.c.bf16 %v640_v50, %v636_v38  ;;  %v670_v1 = vpack.c.bf16 %v642_v51, %v638_v39 }
  0xfd   : > { %v476_v2 = vadd.f32 %v475_v58, %v1791_v62  ;;  %v549_v3 = vadd.f32 %v548_v59, %v1793_v63  ;;  %v644_v4 = vsel %vm580_vm11, %v472_v46, %v612_v54  ;;  %v646_v5 = vsel %vm582_vm12, %v545_v47, %v614_v55 }
  0xfe   : > { %vm583_vm13 = vcmp.ge.f32.partialorder %v474_v56, 0.0  ;;  %v615_v6 = vmul.f32 0.1, %v474_v56  ;;  %vm585_vm14 = vcmp.ge.f32.partialorder %v547_v57, 0.0  ;;  %v617_v7 = vmul.f32 0.1, %v547_v57  ;;  %850 = vmatprep.mubr.bf16.mxu0 %v668_v0  ;;  %1050 = vmatprep.mubr.bf16.mxu1 %v670_v1 }
  0xff   : > { %vm584_vm15 = vcmp.ge.f32.partialorder %v476_v2, 0.0  ;;  %v616_v8 = vmul.f32 0.1, %v476_v2  ;;  %vm586_vm1 = vcmp.ge.f32.partialorder %v549_v3, 0.0  ;;  %v618_v9 = vmul.f32 0.1, %v549_v3  ;;  %851 = vmatmul.mubr.bf16.vlgmr.msra.gmra.mrb[16].mxu0 %v667_v40  ;;  %1051 = vmatmul.mubr.bf16.vlgmr.msra.gmra.mrb[16].mxu1 %v669_v41 }
 0x100   : > { %v479_v12 = vpop.f32.mrb[8].mxu0  ;;  %v552_v13 = vpop.f32.mrb[8].mxu1  ;;  %v643_v16 = vsel %vm579_vm9, %v470_v42, %v611_v52  ;;  %v647_v17 = vsel %vm583_vm13, %v474_v56, %v615_v6  ;;  %v645_v18 = vsel %vm581_vm10, %v543_v43, %v613_v53  ;;  %v649_v19 = vsel %vm585_vm14, %v547_v57, %v617_v7 }
 0x101   : > { %v480_v20 = vadd.f32 %v479_v12, %v1787_v60  ;;  %v1819_v21 = vadd.f32 %v552_v13, %v1789_v61  ;;  %v481_v22 = vpop.f32.mrb[9].mxu0  ;;  %v554_v23 = vpop.f32.mrb[9].mxu1  ;;  %v648_v24 = vsel %vm584_vm15, %v476_v2, %v616_v8  ;;  %v650_v27 = vsel %vm586_vm1, %v549_v3, %v618_v9 }
 0x102   : > { %v482_v28 = vadd.f32 %v481_v22, %v1791_v62  ;;  %v555_v29 = vadd.f32 %v554_v23, %v1793_v63  ;;  %v483_v30 = vpop.f32.mrb[10].mxu0  ;;  %v556_v31 = vpop.f32.mrb[10].mxu1  ;;  %v672_v32 = vpack.c.bf16 %v648_v24, %v644_v4  ;;  %v674_v33 = vpack.c.bf16 %v650_v27, %v646_v5 }
 0x103   : > { %vm587_vm2 = vcmp.ge.f32.partialorder %v480_v20, 0.0  ;;  %v619_v34 = vmul.f32 0.1, %v480_v20  ;;  %vm589_vm3 = vcmp.ge.f32.partialorder %v1819_v21, 0.0  ;;  %v621_v35 = vmul.f32 0.1, %v1819_v21 }
 0x104   : > { %vm588_vm4 = vcmp.ge.f32.partialorder %v482_v28, 0.0  ;;  %v620_v38 = vmul.f32 0.1, %v482_v28  ;;  %vm590_vm5 = vcmp.ge.f32.partialorder %v555_v29, 0.0  ;;  %v622_v39 = vmul.f32 0.1, %v555_v29  ;;  %858 = vmatprep.mubr.bf16.mxu0 %v672_v32  ;;  %1058 = vmatprep.mubr.bf16.mxu1 %v674_v33 }
 0x105   : > { %v484_v40 = vadd.f32 %v483_v30, %v1787_v60  ;;  %v1828_v41 = vadd.f32 %v556_v31, %v1789_v61  ;;  %v485_v42 = vpop.f32.mrb[11].mxu0  ;;  %v558_v43 = vpop.f32.mrb[11].mxu1  ;;  %v671_v44 = vpack.c.bf16 %v647_v17, %v643_v16  ;;  %v673_v45 = vpack.c.bf16 %v649_v19, %v645_v18 }
 0x106   : > { %v486_v46 = vadd.f32 %v485_v42, %v1791_v62  ;;  %v559_v47 = vadd.f32 %v558_v43, %v1793_v63  ;;  %v489_v48 = vpop.f32.mrb[12].mxu0  ;;  %v562_v49 = vpop.f32.mrb[12].mxu1  ;;  %v652_v50 = vsel %vm588_vm4, %v482_v28, %v620_v38  ;;  %v654_v51 = vsel %vm590_vm5, %v555_v29, %v622_v39 }
 0x107   : > { %vm591_vm6 = vcmp.ge.f32.partialorder %v484_v40, 0.0  ;;  %v623_v52 = vmul.f32 0.1, %v484_v40  ;;  %vm593_vm7 = vcmp.ge.f32.partialorder %v1828_v41, 0.0  ;;  %v625_v53 = vmul.f32 0.1, %v1828_v41  ;;  %859 = vmatmul.mubr.bf16.gmra.mrb[20].mxu0 %v671_v44  ;;  %1059 = vmatmul.mubr.bf16.gmra.mrb[20].mxu1 %v673_v45 }
 0x108   : > { %vm592_vm8 = vcmp.ge.f32.partialorder %v486_v46, 0.0  ;;  %v624_v54 = vmul.f32 0.1, %v486_v46  ;;  %vm594_vm9 = vcmp.ge.f32.partialorder %v559_v47, 0.0  ;;  %v626_v55 = vmul.f32 0.1, %v559_v47 }
 0x109   : > { %v490_v56 = vadd.f32 %v489_v48, %v1787_v60  ;;  %v563_v57 = vadd.f32 %v562_v49, %v1789_v61  ;;  %v491_v58 = vpop.f32.mrb[13].mxu0  ;;  %v564_v59 = vpop.f32.mrb[13].mxu1  ;;  %v651_v0 = vsel %vm587_vm2, %v480_v20, %v619_v34  ;;  %v655_v1 = vsel %vm591_vm6, %v484_v40, %v623_v52 }
 0x10a   : > { %v492_v2 = vadd.f32 %v491_v58, %v1791_v62  ;;  %v565_v3 = vadd.f32 %v564_v59, %v1793_v63  ;;  %v493_v4 = vpop.f32.mrb[14].mxu0  ;;  %v566_v5 = vpop.f32.mrb[14].mxu1  ;;  %v656_v6 = vsel %vm592_vm8, %v486_v46, %v624_v54  ;;  %v658_v7 = vsel %vm594_vm9, %v559_v47, %v626_v55  ;;  %v1859_v46 = vld [vmem:[%s1947_s5] ss:$0 sm:$0xff] }
 0x10b   : > { %vm595_vm10 = vcmp.ge.f32.partialorder %v490_v56, 0.0  ;;  %v627_v8 = vmul.f32 0.1, %v490_v56  ;;  %vm597_vm11 = vcmp.ge.f32.partialorder %v563_v57, 0.0  ;;  %v629_v9 = vmul.f32 0.1, %v563_v57 }
 0x10c   : > { %vm596_vm12 = vcmp.ge.f32.partialorder %v492_v2, 0.0  ;;  %v628_v12 = vmul.f32 0.1, %v492_v2  ;;  %vm598_vm13 = vcmp.ge.f32.partialorder %v565_v3, 0.0  ;;  %v630_v13 = vmul.f32 0.1, %v565_v3 }
 0x10d   : > { %v494_v16 = vadd.f32 %v493_v4, %v1787_v60  ;;  %v567_v17 = vadd.f32 %v566_v5, %v1789_v61  ;;  %v495_v18 = vpop.f32.mrb[15].mxu0  ;;  %v568_v19 = vpop.f32.mrb[15].mxu1  ;;  %v676_v20 = vpack.c.bf16 %v656_v6, %v652_v50  ;;  %v678_v22 = vpack.c.bf16 %v658_v7, %v654_v51 }
 0x10e   : > { %v496_v23 = vadd.f32 %v495_v18, %v1791_v62  ;;  %v569_v24 = vadd.f32 %v568_v19, %v1793_v63  ;;  %v675_v27 = vpack.c.bf16 %v655_v1, %v651_v0  ;;  %v653_v28 = vsel %vm589_vm3, %v1819_v21, %v621_v35  ;;  %v1262_v18 = vld [vmem:[%s1949_s7] ss:$0 sm:$0xff] }
 0x10f   : > { %vm599_vm14 = vcmp.ge.f32.partialorder %v494_v16, 0.0  ;;  %v631_v29 = vmul.f32 0.1, %v494_v16  ;;  %vm601_vm15 = vcmp.ge.f32.partialorder %v567_v17, 0.0  ;;  %v633_v30 = vmul.f32 0.1, %v567_v17  ;;  %866 = vmatprep.mubr.bf16.mxu0 %v676_v20  ;;  %1066 = vmatprep.mubr.bf16.mxu1 %v678_v22 }
 0x110   : > { %vm600_vm1 = vcmp.ge.f32.partialorder %v496_v23, 0.0  ;;  %v632_v60 = vmul.f32 0.1, %v496_v23  ;;  %vm602_vm2 = vcmp.ge.f32.partialorder %v569_v24, 0.0  ;;  %v634_v61 = vmul.f32 0.1, %v569_v24  ;;  %867 = vmatmul.mubr.bf16.gmra.mrb[24].mxu0 %v675_v27 }
 0x111   : > { %v657_v62 = vsel %vm593_vm7, %v1828_v41, %v625_v53  ;;  %v660_v63 = vsel %vm596_vm12, %v492_v2, %v628_v12  ;;  %v662_v31 = vsel %vm598_vm13, %v565_v3, %v630_v13  ;;  %v659_v21 = vsel %vm595_vm10, %v490_v56, %v627_v8 }
 0x112   : > { %v677_v32 = vpack.c.bf16 %v657_v62, %v653_v28  ;;  %v664_v33 = vsel %vm600_vm1, %v496_v23, %v632_v60  ;;  %v666_v34 = vsel %vm602_vm2, %v569_v24, %v634_v61  ;;  %v663_v35 = vsel %vm599_vm14, %v494_v16, %v631_v29 }
 0x113   : > { %v680_v38 = vpack.c.bf16 %v664_v33, %v660_v63  ;;  %v682_v39 = vpack.c.bf16 %v666_v34, %v662_v31  ;;  %v679_v40 = vpack.c.bf16 %v663_v35, %v659_v21  ;;  %v661_v42 = vsel %vm597_vm11, %v563_v57, %v629_v9 }
 0x114   : > { %1067 = vmatmul.mubr.bf16.gmra.mrb[24].mxu1 %v677_v32  ;;  %v665_v43 = vsel %vm601_vm15, %v567_v17, %v633_v30  ;;  %vm1123_vm3 = vcmask 523264  }
 0x115   : > { %874 = vmatprep.mubr.bf16.mxu0 %v680_v38  ;;  %1074 = vmatprep.mubr.bf16.mxu1 %v682_v39  ;;  %v681_v41 = vpack.c.bf16 %v665_v43, %v661_v42 }
 0x118   : > { %875 = vmatmul.mubr.bf16.gmra.mrb[28].mxu0 %v679_v40 }
 0x11c   : > { %1075 = vmatmul.mubr.bf16.gmra.mrb[28].mxu1 %v681_v41 }
 0x1d2   : > { %v1301_v44 = vpop.f32.mrb[16].mxu0  ;;  %v1341_v45 = vpop.f32.mrb[16].mxu1 }
 0x1d3   : > { %v1302_v47 = vpop.f32.mrb[17].mxu0  ;;  %v1342_v48 = vpop.f32.mrb[17].mxu1 }
 0x1d4   : > { %v1303_v49 = vadd.f32 %v1302_v47, %v1301_v44  ;;  %v1304_v50 = vpop.f32.mrb[18].mxu0  ;;  %v1343_v51 = vadd.f32 %v1342_v48, %v1341_v45  ;;  %v1344_v52 = vpop.f32.mrb[18].mxu1 }
 0x1d5   : > { %v1305_v53 = vpop.f32.mrb[19].mxu0  ;;  %v1345_v54 = vpop.f32.mrb[19].mxu1 }
 0x1d6   : > { %v853_v55 = vadd.f32 %v1303_v49, %v1859_v46  ;;  %v1306_v56 = vadd.f32 %v1305_v53, %v1304_v50  ;;  %v1346_v57 = vadd.f32 %v1345_v54, %v1344_v52  ;;  %v1053_v24 = vadd.f32 %v1343_v51, %v1262_v18 }
 0x1d8   : > { %v856_v58 = vadd.f32 %v1306_v56, %v1859_v46  ;;  %v1056_v60 = vadd.f32 %v1346_v57, %v1262_v18 }
 0x1da   : > { %v1307_v59 = vpop.f32.mrb[20].mxu0  ;;  %v1347_v0 = vpop.f32.mrb[20].mxu1 }
 0x1db   : > { %v1308_v1 = vpop.f32.mrb[21].mxu0  ;;  %v1348_v2 = vpop.f32.mrb[21].mxu1 }
 0x1dc   : > { %v1309_v3 = vadd.f32 %v1308_v1, %v1307_v59  ;;  %v1310_v4 = vpop.f32.mrb[22].mxu0  ;;  %v1349_v5 = vadd.f32 %v1348_v2, %v1347_v0  ;;  %v1350_v6 = vpop.f32.mrb[22].mxu1 }
 0x1dd   : > { %v1311_v7 = vpop.f32.mrb[23].mxu0  ;;  %v1351_v8 = vpop.f32.mrb[23].mxu1 }
 0x1de   : > { %v861_v9 = vadd.f32 %v1309_v3, %v1859_v46  ;;  %v1312_v12 = vadd.f32 %v1311_v7, %v1310_v4  ;;  %v1352_v13 = vadd.f32 %v1351_v8, %v1350_v6  ;;  %v1061_v48 = vadd.f32 %v1349_v5, %v1262_v18 }
 0x1e0   : > { %v864_v16 = vadd.f32 %v1312_v12, %v1859_v46  ;;  %v1064_v53 = vadd.f32 %v1352_v13, %v1262_v18 }
 0x1e3   : > { %v1313_v17 = vpop.f32.mrb[24].mxu0 }
 0x1e4   : > { %v1314_v19 = vpop.f32.mrb[25].mxu0 }
 0x1e5   : > { %v1315_v20 = vadd.f32 %v1314_v19, %v1313_v17  ;;  %v1316_v22 = vpop.f32.mrb[26].mxu0 }
 0x1e6   : > { %v1317_v23 = vpop.f32.mrb[27].mxu0 }
 0x1e7   : > { %v1353_v27 = vpop.f32.mrb[24].mxu1  ;;  %v869_v28 = vadd.f32 %v1315_v20, %v1859_v46  ;;  %v1318_v29 = vadd.f32 %v1317_v23, %v1316_v22 }
 0x1e8   : > { %v1354_v30 = vpop.f32.mrb[25].mxu1 }
 0x1e9   : > { %v1087_v61 = vadd.f32 %v1053_v24, %v869_v28  ;;  %v1355_v62 = vadd.f32 %v1354_v30, %v1353_v27  ;;  %v1356_v63 = vpop.f32.mrb[26].mxu1  ;;  %v872_v31 = vadd.f32 %v1318_v29, %v1859_v46 }
 0x1ea   : > { %v1357_v21 = vpop.f32.mrb[27].mxu1 }
 0x1eb   : > { %v1069_v32 = vadd.f32 %v1355_v62, %v1262_v18  ;;  %v1088_v33 = vadd.f32 %v1056_v60, %v872_v31  ;;  %v1358_v34 = vadd.f32 %v1357_v21, %v1356_v63  ;;  %v1319_v35 = vpop.f32.mrb[28].mxu0  ;;  %v1099_v38 = vadd.f32 %v1087_v61, %v1696_v25 }
 0x1ec   : > { %v1320_v39 = vpop.f32.mrb[29].mxu0 }
 0x1ed   : > { %v1083_v40 = vsub.f32 %v853_v55, %v1069_v32  ;;  %v1072_v42 = vadd.f32 %v1358_v34, %v1262_v18  ;;  %v1321_v43 = vadd.f32 %v1320_v39, %v1319_v35  ;;  %v1322_v41 = vpop.f32.mrb[30].mxu0  ;;  %v1103_v44 = vsel %vm412_vm0, %v1099_v38, %v1087_v61 }
 0x1ee   : > { %v1323_v45 = vpop.f32.mrb[31].mxu0  ;;  %1111 = vrot.lane.b32.xlu0 %v1103_v44, %s1517_s24  ;;  %v1100_v47 = vadd.f32 %v1088_v33, %v1698_v26 }
 0x1ef   : > { %v1084_v49 = vsub.f32 %v856_v58, %v1072_v42  ;;  %v1359_v50 = vpop.f32.mrb[28].mxu1  ;;  %v877_v51 = vadd.f32 %v1321_v43, %v1859_v46  ;;  %v1324_v52 = vadd.f32 %v1323_v45, %v1322_v41  ;;  %v1091_v8 = vadd.f32 %v1083_v40, %v1650_v10 }
 0x1f0   : > { %v1360_v25 = vpop.f32.mrb[29].mxu1  ;;  %v1104_v59 = vsel %vm412_vm0, %v1100_v47, %v1088_v33 }
 0x1f1   : > { %v1089_v54 = vadd.f32 %v1061_v48, %v877_v51  ;;  %v1361_v55 = vadd.f32 %v1360_v25, %v1359_v50  ;;  %v1362_v56 = vpop.f32.mrb[30].mxu1  ;;  %v880_v57 = vadd.f32 %v1324_v52, %v1859_v46  ;;  %v1092_v12 = vadd.f32 %v1084_v49, %v1652_v11 }
 0x1f2   : > { %v1363_v0 = vpop.f32.mrb[31].mxu1  ;;  %1113 = vrot.lane.b32.xlu0 %v1104_v59, %s1517_s24 }
 0x1f3   : > { %v1077_v1 = vadd.f32 %v1361_v55, %v1262_v18  ;;  %v1090_v26 = vadd.f32 %v1064_v53, %v880_v57  ;;  %v1364_v2 = vadd.f32 %v1363_v0, %v1362_v56  ;;  %v1101_v58 = vadd.f32 %v1089_v54, %v1730_v36 }
 0x1f4   : > { %v1096_v17 = vsel %vm412_vm0, %v1092_v12, %v1084_v49 }
 0x1f5   : > { %v1085_v3 = vsub.f32 %v861_v9, %v1077_v1  ;;  %v1080_v4 = vadd.f32 %v1364_v2, %v1262_v18  ;;  %v1105_v5 = vsel %vm412_vm0, %v1101_v58, %v1089_v54  ;;  %v1102_v6 = vadd.f32 %v1090_v26, %v1732_v37 }
 0x1f6   : > { %1115 = vrot.lane.b32.xlu1 %v1105_v5, %s1517_s24  ;;  %v1095_v9 = vsel %vm412_vm0, %v1091_v8, %v1083_v40 }
 0x1f7   : > { %v1086_v7 = vsub.f32 %v864_v16, %v1080_v4  ;;  %v1106_v46 = vsel %vm412_vm0, %v1102_v6, %v1090_v26  ;;  %v1093_v37 = vadd.f32 %v1085_v3, %v1659_v14 }
 0x1f9   : > { %v1094_v10 = vadd.f32 %v1086_v7, %v1661_v15  ;;  %v1097_v19 = vsel %vm412_vm0, %v1093_v37, %v1085_v3 }
 0x1fa   : > { %1117 = vrot.lane.b32.xlu1 %v1106_v46, %s1517_s24 }
 0x1fb   : > { %v1098_v22 = vsel %vm412_vm0, %v1094_v10, %v1086_v7 }
 0x260   : > { %v1112_v36 = vpop.permute.xlu0 %1111 }
 0x261   : > { %v1124_v13 = vsel %vm1123_vm3, %v1095_v9, %v1112_v36 }
 0x262   : > { %1128 = vst [vmem:[%s315_s26] sm:$0xff] %v1124_v13 }
 0x264   : > { %v1114_v16 = vpop.permute.xlu0 %1113 }
 0x265   : > { %v1125_v18 = vsel %vm1123_vm3, %v1096_v17, %v1114_v16 }
 0x266   : > { %1129 = vst [vmem:[%s315_s26 + $0x8] sm:$0xff] %v1125_v18 }
 0x268   : > { %v1116_v11 = vpop.permute.xlu1 %1115 }
 0x269   : > { %v1126_v20 = vsel %vm1123_vm3, %v1097_v19, %v1116_v11 }
 0x26a   : > { %1130 = vst [vmem:[%s315_s26 + $0x10] sm:$0xff] %v1126_v20 }
 0x26c   : > { %v1118_v14 = vpop.permute.xlu1 %1117 }
 0x26d   : > { %v1127_v15 = vsel %vm1123_vm3, %v1098_v22, %v1118_v14 }
 0x26e   : > { %1131 = vst [vmem:[%s315_s26 + $0x18] sm:$0xff] %v1127_v15 }
 0x26f   : > { %1465 = shalt.err (!%p1462_p3)
}
 0x270   : > { %s1466_s24 = scalar_lea.hbm %s1898_s18, 512  ;;  %s1470_s26 = scalar_lea.hbm %s1950_s8, 1024 }
 0x271   : > { %p1467_p4 = scmp.ne.s32.totalorder %s1898_s18, %s1466_s24  ;;  %p1471_p9 = scmp.lt.u32.totalorder %s1898_s18, %s1950_s8 }
 0x272   : > { %p1472_p10 = scmp.lt.u32.totalorder %s1470_s26, %s1466_s24  ;;  %p1474_p12 = scmp.lt.u32.totalorder %s1466_s24, %s1898_s18 }
 0x273   : > { %p1468_p7 = pnand %p1467_p4, %p1604_p5 }
 0x274   : > { %p1473_p11 = por %p1472_p10, %p1471_p9 }
 0x275   : > { %p1469_p8 = pneg %p1468_p7 }
 0x276   : > { %p1475_p13 = por %p1474_p12, %p1473_p11 }
 0x278   : > { %p1476_p0 = pnand %p1475_p13, %p1469_p8 }
 0x27a   : > { %1479 = shalt.err (!%p1476_p0)
}
 0x27b   : > { %s1519_s17 = smov 128   ;;  %s1520_s9 = smov 8  }
 0x27c   : > { %1365 = dma.vmem_to_hbm [thread:$0]  (%p1604_p5), %s1892_s10, 512, %s1898_s18, %s1901_s13, %s1519_s17, %s1519_s17, %s1520_s9  }
 0x27d PF: > { %p1371_p1 = scmp.ge.s32.totalorder %s1514_s30, 2  ;;  %s1161_s20 = sand.u32 1, %s1502_s27  }
 0x27e   : > { %s1162_s21 = scalar_lea.sflag [#allocation3], %s1161_s20 }
 0x27f   : > { %p1368_p2 = pnand %p1371_p1, %p1608_p6 }
 0x281   : > { %1497 = dma.done.wait (!%p1368_p2), %s1162_s21, 512  }
 0x282   : > { %1499 = vsyncadd (!%p1368_p2), %s1162_s21, 4294966784  ;;  %p18_p3 = scmp.ge.s32.totalorder %s1591_s11, 4   ;;  %s1953_s27 = smov %s1506_s28 }
 0x283   : > { %s1954_s28 = smov %s1510_s29  ;;  %s1955_s29 = smov %s1602_s14 }
 0x284   : > { %s1956_s30 = smov %s1591_s11  ;;  %20 = sbr.rel (!%p18_p3) target bundleno = 3 (0x3), region = 90 }
 0x28b   :  { %1167 = vsyncpa [#allocation3], 1 }
 0x28c   :  { %1169 = vsyncpa [#allocation3 + $0x1], 1 }

// kernel: tpu_custom_call.1
= control target key start
LH: loop header
LB: loop body
LE: loop exit
PB: predicated region body
PF: predicated region fallthrough
CT: control target
= control target key end

     0   :  { %13 = vsyncpa [#allocation3], 0  ;;  %s1942_s0 = inlined_call_operand.vmem [shape: f32[64,64], index: 0, kind: input, shape index: {}]   ;;  %s1943_s1 = inlined_call_operand.vmem [shape: f32[64,64], index: 1, kind: input, shape index: {}]   ;;  %s1944_s2 = inlined_call_operand.vmem [shape: bf16[32,512], index: 2, kind: input, shape index: {}]   ;;  %s1945_s3 = inlined_call_operand.vmem [shape: f32[1,512], index: 3, kind: input, shape index: {}]   ;;  %s1946_s4 = inlined_call_operand.vmem [shape: bf16[256,64], index: 4, kind: input, shape index: {}]   ;;  %s1947_s5 = inlined_call_operand.vmem [shape: f32[1,64], index: 5, kind: input, shape index: {}]   ;;  %s1948_s6 = inlined_call_operand.vmem [shape: bf16[256,64], index: 6, kind: input, shape index: {}]   ;;  %s1949_s7 = inlined_call_operand.vmem [shape: f32[1,64], index: 7, kind: input, shape index: {}]   ;;  %s1950_s8 = inlined_call_operand.hbm [shape: f32[64,128], index: 8, kind: output, shape index: {}]  }
   0x1   :  { %15 = vsyncpa [#allocation3 + $0x1], 0  ;;  %s1566_s27 = smov 0   ;;  %s1568_s28 = smov 0  }
   0x2   :  { %s1570_s29 = smov 0   ;;  %s1572_s30 = smov 0  }
   0x3 LB: > { %s1587_s9 = sadd.s32 4294967295, %s1514_s30   ;;  %s1220_s10 = sadd.s32 4294967294, %s1514_s30   ;;  %s1514_s30 = sphi %s1572_s30, %s1956_s30   ;;  %s1510_s29 = sphi %s1570_s29, %s1955_s29   ;;  %s1506_s28 = sphi %s1568_s28, %s1954_s28   ;;  %s1502_s27 = sphi %s1566_s27, %s1953_s27  }
   0x4   : > { %s1591_s11 = sadd.s32 1, %s1514_s30   ;;  %s206_s12 = sadd.s32 1, %s1510_s29 }
   0x5   : > { %s203_s13 = ssub.s32 %s1514_s30, %s1591_s11  ;;  %p216_p0 = scmp.ne.s32.totalorder %s1510_s29, %s1506_s28 }
   0x6   : > { %p204_p1 = scmp.eq.s32.totalorder %s203_s13, 0  ;;  %p217_p2 = scmp.eq.s32.totalorder %s1587_s9, 1 }
   0x7   : > { %p222_p3 = scmp.ne.s32.totalorder %s1506_s28, %s1502_s27  ;;  %p223_p4 = scmp.eq.s32.totalorder %s1220_s10, 1 }
   0x8   : > { %s1602_s14 = scalar_select %p204_p1, %s1510_s29, %s206_s12  }
   0x9   : > { %p1604_p5 = por %p217_p2, %p216_p0  ;;  %p1608_p6 = por %p223_p4, %p222_p3 }
   0xa   : > { %p1223_p7 = scmp.ge.s32.totalorder %s1514_s30, 1  ;;  %p277_p8 = scmp.lt.s32.totalorder %s1514_s30, 3 }
   0xc   : > { %p278_p9 = pnand %p1223_p7, %p277_p8 }
   0xd   : > { %v1408_v0 = vld [vmem:[%s1944_s2 + $0x4] ss:$16 sps:$4 sm:$0xff] (!%p278_p9)   ;;  %s1225_s19 = sshll.u32 (!%p278_p9), %s1587_s9, 2  ;;  %v1410_v1 = vld [vmem:[%s1944_s2 + $0xc] ss:$16 sps:$4 sm:$0xff] (!%p278_p9)   ;;  %v1516_v2 = vmov (!%p278_p9), 0   ;;  %v352_v53 = vlaneseq (!%p278_p9) }
   0xe   : > { %281 = sbr.rel (%p278_p9) target bundleno = 637 (0x27d), region = 52  ;;  %457 = vmatprep.mubr.bf16.mxu0 (!%p278_p9), %v1516_v2  ;;  %530 = vmatprep.mubr.bf16.mxu1 (!%p278_p9), %v1516_v2  ;;  %p317_p10 = scmp.lt.s32.totalorder (!%p278_p9), %s1225_s19, 7  ;;  %v1412_v3 = vld [vmem:[%s1944_s2] ss:$16 sps:$4 sm:$0xff] (!%p278_p9)   ;;  %v1413_v4 = vld [vmem:[%s1944_s2 + $0x8] ss:$16 sps:$4 sm:$0xff] (!%p278_p9)  }
   0xf   : > { %425 = vmatprep.subr.bf16.mxu0 (!%p278_p9), %v1408_v0  ;;  %498 = vmatprep.subr.bf16.mxu1 (!%p278_p9), %v1410_v1  ;;  %v1414_v5 = vld [vmem:[%s1944_s2 + $0x24] ss:$16 sps:$4 sm:$0xff] (!%p278_p9)   ;;  %v1416_v6 = vld [vmem:[%s1944_s2 + $0x2c] ss:$16 sps:$4 sm:$0xff] (!%p278_p9)   ;;  %v1418_v7 = vld [vmem:[%s1944_s2 + $0x20] ss:$16 sps:$4 sm:$0xff] (!%p278_p9)  }
  0x10   : > { %426 = vmatpush1.bf16.msra.mxu0 (!%p278_p9), %v1412_v3  ;;  %499 = vmatpush1.bf16.msra.mxu1 (!%p278_p9), %v1413_v4  ;;  %v1419_v8 = vld [vmem:[%s1944_s2 + $0x28] ss:$16 sps:$4 sm:$0xff] (!%p278_p9)   ;;  %v1420_v9 = vld [vmem:[%s1946_s4 + $0x40] sm:$0xff] (!%p278_p9)   ;;  %vm412_vm0 = vcmask (!%p278_p9), 261120   ;;  %v1428_v23 = vld [vmem:[%s1946_s4 + $0x50] sm:$0xff] (!%p278_p9)   ;;  %v353_v54 = vshrl.u32 (!%p278_p9), %v352_v53, 7 }
  0x11   : > { %427 = vmatprep.subr.bf16.mxu0 (!%p278_p9), %v1414_v5  ;;  %500 = vmatprep.subr.bf16.mxu1 (!%p278_p9), %v1416_v6  ;;  %v1421_v13 = vld [vmem:[%s1946_s4] sm:$0xff] (!%p278_p9)   ;;  %v1424_v18 = vld [vmem:[%s1946_s4 + $0x48] sm:$0xff] (!%p278_p9)   ;;  %v1429_v24 = vld [vmem:[%s1946_s4 + $0x10] sm:$0xff] (!%p278_p9)   ;;  %s1517_s24 = smov (!%p278_p9), 64   ;;  %s1518_s20 = smov (!%p278_p9), [#allocation2]  }
  0x12   : > { %v1422_v16 = vld [vmem:[%s1948_s6 + $0x40] sm:$0xff] (!%p278_p9)   ;;  %v1425_v19 = vld [vmem:[%s1946_s4 + $0x8] sm:$0xff] (!%p278_p9)   ;;  %v1430_v27 = vld [vmem:[%s1948_s6 + $0x50] sm:$0xff] (!%p278_p9)   ;;  %v354_v55 = vsub.s32 (!%p278_p9), 0, %v353_v54  ;;  %v362_v56 = vsub.s32 (!%p278_p9), 2, %v353_v54  ;;  %v358_v58 = vsub.s32 (!%p278_p9), 1, %v353_v54 }
  0x13   : > { %v1423_v17 = vld [vmem:[%s1948_s6] sm:$0xff] (!%p278_p9)   ;;  %v1426_v20 = vld [vmem:[%s1948_s6 + $0x48] sm:$0xff] (!%p278_p9)   ;;  %v1431_v28 = vld [vmem:[%s1948_s6 + $0x10] sm:$0xff] (!%p278_p9)   ;;  %v366_v59 = vsub.s32 (!%p278_p9), 3, %v353_v54  ;;  %s1456_s21 = sshll.u32 (!%p278_p9), %s1518_s20, 4  ;;  %s1457_s21 = int_to_ptr.vmem [resolvable:$false] %s1456_s21 }
  0x14   : > { %428 = vmatpush1.bf16.msra.mxu0 (!%p278_p9), %v1418_v7  ;;  %501 = vmatpush1.bf16.msra.mxu1 (!%p278_p9), %v1419_v8  ;;  %v1427_v22 = vld [vmem:[%s1948_s6 + $0x8] sm:$0xff] (!%p278_p9)   ;;  %v1432_v29 = vld [vmem:[%s1946_s4 + $0x58] sm:$0xff] (!%p278_p9)   ;;  %v1436_v34 = vld [vmem:[%s1946_s4 + $0x60] sm:$0xff] (!%p278_p9)   ;;  %s1458_s23 = scalar_lea.vmem (!%p278_p9), %s1457_s21, 1024 }
  0x15   : > { %s1958_s19 = smov (!%p317_p10, %s1225_s19), 7  ;;  %1285 = vmatprep.subr.bf16.mxu0 %v1420_v9  ;;  %1325 = vmatprep.subr.bf16.mxu1 %v1422_v16  ;;  %v1433_v30 = vld [vmem:[%s1946_s4 + $0x18] sm:$0xff]   ;;  %v1437_v35 = vld [vmem:[%s1946_s4 + $0x20] sm:$0xff]   ;;  %v1440_v40 = vld [vmem:[%s1946_s4 + $0x68] sm:$0xff]  }
  0x16   : > { %s1226_s22 = sshll.u32 %s1958_s19, 3  ;;  %v1434_v31 = vld [vmem:[%s1948_s6 + $0x58] sm:$0xff]   ;;  %v1438_v38 = vld [vmem:[%s1948_s6 + $0x60] sm:$0xff]   ;;  %v1442_v42 = vld [vmem:[%s1948_s6 + $0x68] sm:$0xff]   ;;  %s1284_s19 = sshll.u32 %s1587_s9, 9 }
  0x17   : > { %s320_s10 = scalar_lea.vmem %s1942_s0, %s1226_s22  ;;  %s326_s13 = scalar_lea.vmem %s1943_s1, %s1226_s22  ;;  %v1435_v33 = vld [vmem:[%s1948_s6 + $0x18] sm:$0xff]   ;;  %v1439_v39 = vld [vmem:[%s1948_s6 + $0x20] sm:$0xff]   ;;  %v1441_v43 = vld [vmem:[%s1946_s4 + $0x28] sm:$0xff]  }
  0x18   : > { %v1650_v10 = vld [vmem:[%s320_s10] sm:$0xff]  ;;  %v1652_v11 = vld [vmem:[%s320_s10 + $0x8] sm:$0xff]  ;;  %v1659_v14 = vld [vmem:[%s320_s10 + $0x10] sm:$0xff]  ;;  %s313_s22 = sand.u32 1, %s1506_s28   ;;  %s1898_s18 = scalar_lea.hbm %s1950_s8, %s1284_s19 }
  0x19   : > { %v338_v12 = vpack.c.bf16 %v1652_v11, %v1650_v10  ;;  %v1661_v15 = vld [vmem:[%s320_s10 + $0x18] sm:$0xff]  ;;  %v1696_v25 = vld [vmem:[%s326_s13] sm:$0xff]  ;;  %v1698_v26 = vld [vmem:[%s326_s13 + $0x8] sm:$0xff]  ;;  %s1224_s25 = sshll.u32 %s313_s22, 5 }
  0x1a   : > { %v339_v21 = vpack.c.bf16 %v1661_v15, %v1659_v14  ;;  %v340_v32 = vpack.c.bf16 %v1698_v26, %v1696_v25  ;;  %v1730_v36 = vld [vmem:[%s326_s13 + $0x10] sm:$0xff]  ;;  %v1732_v37 = vld [vmem:[%s326_s13 + $0x18] sm:$0xff]  ;;  %v1443_v44 = vld [vmem:[%s1948_s6 + $0x28] sm:$0xff]   ;;  %s315_s26 = scalar_lea.vmem [#allocation2], %s1224_s25  ;;  %s1901_s13 = scalar_lea.sflag [#allocation3], %s313_s22 }
  0x1b   : > { %1237 = vmatmul.mubr.msk.bf16.vlgmr.msra.gmra.mrb[0].mxu0 %vm412_vm0, %v338_v12  ;;  %1241 = vmatmul.mubr.msk.bf16.vlgmr.msra.gmra.mrb[0].mxu1 %vm412_vm0, %v338_v12  ;;  %v341_v41 = vpack.c.bf16 %v1732_v37, %v1730_v36  ;;  %v1444_v45 = vld [vmem:[%s1946_s4 + $0x70] sm:$0xff]   ;;  %v1448_v49 = vld [vmem:[%s1946_s4 + $0x78] sm:$0xff]   ;;  %v350_v57 = vld [vmem:[%s1945_s3] sm:$0xf]  ;;  %s1146_s10 = sshll.u32 %s315_s26, 4  ;;  %s1892_s10 = int_to_ptr.vmem [resolvable:$true] %s1146_s10 }
  0x1c   : > { %467 = vmatprep.mubr.bf16.mxu0 %v1516_v2  ;;  %540 = vmatprep.mubr.bf16.mxu1 %v1516_v2  ;;  %v1446_v46 = vld [vmem:[%s1948_s6 + $0x70] sm:$0xff]   ;;  %v1450_v50 = vld [vmem:[%s1948_s6 + $0x78] sm:$0xff]   ;;  %v1787_v60 = vrot.slane %v350_v57, %v354_v55  ;;  %v1789_v61 = vrot.slane %v350_v57, %v362_v56  ;;  %v1791_v62 = vrot.slane %v350_v57, %v358_v58  ;;  %s1452_s9 = scalar_lea.vmem %s1892_s10, 512  ;;  %p1459_p0 = scmp.lt.s32.totalorder %s1892_s10, %s1457_s21 }
  0x1d   : > { %1286 = vmatpush3.bf16.msra.mxu0 %v1421_v13  ;;  %1326 = vmatpush3.bf16.msra.mxu1 %v1423_v17  ;;  %v1445_v47 = vld [vmem:[%s1946_s4 + $0x30] sm:$0xff]   ;;  %v1449_v51 = vld [vmem:[%s1946_s4 + $0x38] sm:$0xff]   ;;  %v1793_v63 = vrot.slane %v350_v57, %v366_v59  ;;  %p1453_p11 = scmp.ne.s32.totalorder %s1892_s10, %s1452_s9  ;;  %p1460_p1 = scmp.lt.s32.totalorder %s1458_s23, %s1452_s9 }
  0x1e   : > { %1287 = vmatprep.subr.bf16.mxu0 %v1424_v18  ;;  %1327 = vmatprep.subr.bf16.mxu1 %v1426_v20  ;;  %v1447_v48 = vld [vmem:[%s1948_s6 + $0x30] sm:$0xff]   ;;  %v1451_v52 = vld [vmem:[%s1948_s6 + $0x38] sm:$0xff]  }
  0x1f   : > { %p1454_p12 = pnand %p1453_p11, %p1604_p5  ;;  %p1461_p2 = por %p1460_p1, %p1459_p0 }
  0x21   : > { %1288 = vmatpush3.bf16.msra.mxu0 %v1425_v19  ;;  %1328 = vmatpush3.bf16.msra.mxu1 %v1427_v22  ;;  %p1455_p13 = pneg %p1454_p12 }
  0x22   : > { %1289 = vmatprep.subr.bf16.mxu0 %v1428_v23  ;;  %1329 = vmatprep.subr.bf16.mxu1 %v1430_v27 }
  0x23   : > { %1238 = vmatmul.mubr.msk.bf16.gmra.mrb[4].mxu0 %vm412_vm0, %v339_v21  ;;  %1242 = vmatmul.mubr.msk.bf16.gmra.mrb[4].mxu1 %vm412_vm0, %v339_v21  ;;  %p1462_p3 = pnand %p1461_p2, %p1455_p13 }
  0x24   : > { %477 = vmatprep.mubr.bf16.mxu0 %v1516_v2  ;;  %550 = vmatprep.mubr.bf16.mxu1 %v1516_v2 }
  0x25   : > { %1290 = vmatpush3.bf16.msra.mxu0 %v1429_v24  ;;  %1330 = vmatpush3.bf16.msra.mxu1 %v1431_v28 }
  0x26   : > { %1291 = vmatprep.subr.bf16.mxu0 %v1432_v29  ;;  %1331 = vmatprep.subr.bf16.mxu1 %v1434_v31 }
  0x29   : > { %1292 = vmatpush3.bf16.msra.mxu0 %v1433_v30  ;;  %1332 = vmatpush3.bf16.msra.mxu1 %v1435_v33 }
  0x2a   : > { %1293 = vmatprep.subr.bf16.mxu0 %v1436_v34  ;;  %1333 = vmatprep.subr.bf16.mxu1 %v1438_v38 }
  0x2b   : > { %1239 = vmatmul.mubr.msk.bf16.gmra.mrb[8].mxu0 %vm412_vm0, %v340_v32  ;;  %1243 = vmatmul.mubr.msk.bf16.gmra.mrb[8].mxu1 %vm412_vm0, %v340_v32 }
  0x2c   : > { %487 = vmatprep.mubr.bf16.mxu0 %v1516_v2  ;;  %560 = vmatprep.mubr.bf16.mxu1 %v1516_v2 }
  0x2d   : > { %1294 = vmatpush3.bf16.msra.mxu0 %v1437_v35  ;;  %1334 = vmatpush3.bf16.msra.mxu1 %v1439_v39 }
  0x2e   : > { %1295 = vmatprep.subr.bf16.mxu0 %v1440_v40  ;;  %1335 = vmatprep.subr.bf16.mxu1 %v1442_v42 }
  0x31   : > { %1296 = vmatpush3.bf16.msra.mxu0 %v1441_v43  ;;  %1336 = vmatpush3.bf16.msra.mxu1 %v1443_v44 }
  0x32   : > { %1297 = vmatprep.subr.bf16.mxu0 %v1444_v45  ;;  %1337 = vmatprep.subr.bf16.mxu1 %v1446_v46 }
  0x33   : > { %1240 = vmatmul.mubr.msk.bf16.gmra.mrb[12].mxu0 %vm412_vm0, %v341_v41  ;;  %1244 = vmatmul.mubr.msk.bf16.gmra.mrb[12].mxu1 %vm412_vm0, %v341_v41 }
  0x35   : > { %1298 = vmatpush3.bf16.msra.mxu0 %v1445_v47  ;;  %1338 = vmatpush3.bf16.msra.mxu1 %v1447_v48 }
  0x36   : > { %1299 = vmatprep.subr.bf16.mxu0 %v1448_v49  ;;  %1339 = vmatprep.subr.bf16.mxu1 %v1450_v50 }
  0x39   : > { %1300 = vmatpush3.bf16.msra.mxu0 %v1449_v51  ;;  %1340 = vmatpush3.bf16.msra.mxu1 %v1451_v52 }
  0xee   : > { %v459_v0 = vpop.f32.mrb[0].mxu0  ;;  %v532_v1 = vpop.f32.mrb[0].mxu1 }
  0xef   : > { %v460_v2 = vadd.f32 %v459_v0, %v1787_v60  ;;  %v533_v3 = vadd.f32 %v532_v1, %v1789_v61  ;;  %v461_v4 = vpop.f32.mrb[1].mxu0  ;;  %v534_v5 = vpop.f32.mrb[1].mxu1 }
  0xf0   : > { %v462_v6 = vadd.f32 %v461_v4, %v1791_v62  ;;  %v535_v7 = vadd.f32 %v534_v5, %v1793_v63  ;;  %v463_v8 = vpop.f32.mrb[2].mxu0  ;;  %v536_v9 = vpop.f32.mrb[2].mxu1 }
  0xf1   : > { %vm571_vm1 = vcmp.ge.f32.partialorder %v460_v2, 0.0  ;;  %v603_v12 = vmul.f32 0.1, %v460_v2  ;;  %vm573_vm2 = vcmp.ge.f32.partialorder %v533_v3, 0.0  ;;  %v605_v13 = vmul.f32 0.1, %v533_v3 }
  0xf2   : > { %vm572_vm3 = vcmp.ge.f32.partialorder %v462_v6, 0.0  ;;  %v604_v16 = vmul.f32 0.1, %v462_v6  ;;  %vm574_vm4 = vcmp.ge.f32.partialorder %v535_v7, 0.0  ;;  %v606_v17 = vmul.f32 0.1, %v535_v7 }
  0xf3   : > { %v464_v18 = vadd.f32 %v463_v8, %v1787_v60  ;;  %v537_v19 = vadd.f32 %v536_v9, %v1789_v61  ;;  %v465_v20 = vpop.f32.mrb[3].mxu0  ;;  %v538_v21 = vpop.f32.mrb[3].mxu1  ;;  %v635_v22 = vsel %vm571_vm1, %v460_v2, %v603_v12  ;;  %v637_v23 = vsel %vm573_vm2, %v533_v3, %v605_v13 }
  0xf4   : > { %v466_v24 = vadd.f32 %v465_v20, %v1791_v62  ;;  %v539_v27 = vadd.f32 %v538_v21, %v1793_v63  ;;  %v636_v38 = vsel %vm572_vm3, %v462_v6, %v604_v16  ;;  %v638_v39 = vsel %vm574_vm4, %v535_v7, %v606_v17 }
  0xf5   : > { %vm575_vm5 = vcmp.ge.f32.partialorder %v464_v18, 0.0  ;;  %v607_v28 = vmul.f32 0.1, %v464_v18  ;;  %vm577_vm6 = vcmp.ge.f32.partialorder %v537_v19, 0.0  ;;  %v609_v29 = vmul.f32 0.1, %v537_v19 }
  0xf6   : > { %vm576_vm7 = vcmp.ge.f32.partialorder %v466_v24, 0.0  ;;  %v608_v30 = vmul.f32 0.1, %v466_v24  ;;  %vm578_vm8 = vcmp.ge.f32.partialorder %v539_v27, 0.0  ;;  %v610_v31 = vmul.f32 0.1, %v539_v27 }
  0xf7   : > { %v639_v32 = vsel %vm575_vm5, %v464_v18, %v607_v28  ;;  %v641_v33 = vsel %vm577_vm6, %v537_v19, %v609_v29  ;;  %v469_v34 = vpop.f32.mrb[4].mxu0  ;;  %v542_v35 = vpop.f32.mrb[4].mxu1 }
  0xf8   : > { %v667_v40 = vpack.c.bf16 %v639_v32, %v635_v22  ;;  %v669_v41 = vpack.c.bf16 %v641_v33, %v637_v23  ;;  %v470_v42 = vadd.f32 %v469_v34, %v1787_v60  ;;  %v543_v43 = vadd.f32 %v542_v35, %v1789_v61  ;;  %v471_v44 = vpop.f32.mrb[5].mxu0  ;;  %v544_v45 = vpop.f32.mrb[5].mxu1 }
  0xf9   : > { %v472_v46 = vadd.f32 %v471_v44, %v1791_v62  ;;  %v545_v47 = vadd.f32 %v544_v45, %v1793_v63  ;;  %v473_v48 = vpop.f32.mrb[6].mxu0  ;;  %v546_v49 = vpop.f32.mrb[6].mxu1  ;;  %v640_v50 = vsel %vm576_vm7, %v466_v24, %v608_v30  ;;  %v642_v51 = vsel %vm578_vm8, %v539_v27, %v610_v31 }
  0xfa   : > { %vm579_vm9 = vcmp.ge.f32.partialorder %v470_v42, 0.0  ;;  %v611_v52 = vmul.f32 0.1, %v470_v42  ;;  %vm581_vm10 = vcmp.ge.f32.partialorder %v543_v43, 0.0  ;;  %v613_v53 = vmul.f32 0.1, %v543_v43 }
  0xfb   : > { %vm580_vm11 = vcmp.ge.f32.partialorder %v472_v46, 0.0  ;;  %v612_v54 = vmul.f32 0.1, %v472_v46  ;;  %vm582_vm12 = vcmp.ge.f32.partialorder %v545_v47, 0.0  ;;  %v614_v55 = vmul.f32 0.1, %v545_v47 }
  0xfc   : > { %v474_v56 = vadd.f32 %v473_v48, %v1787_v60  ;;  %v547_v57 = vadd.f32 %v546_v49, %v1789_v61  ;;  %v475_v58 = vpop.f32.mrb[7].mxu0  ;;  %v548_v59 = vpop.f32.mrb[7].mxu1  ;;  %v668_v0 = vpack.c.bf16 %v640_v50, %v636_v38  ;;  %v670_v1 = vpack.c.bf16 %v642_v51, %v638_v39 }
  0xfd   : > { %v476_v2 = vadd.f32 %v475_v58, %v1791_v62  ;;  %v549_v3 = vadd.f32 %v548_v59, %v1793_v63  ;;  %v644_v4 = vsel %vm580_vm11, %v472_v46, %v612_v54  ;;  %v646_v5 = vsel %vm582_vm12, %v545_v47, %v614_v55 }
  0xfe   : > { %vm583_vm13 = vcmp.ge.f32.partialorder %v474_v56, 0.0  ;;  %v615_v6 = vmul.f32 0.1, %v474_v56  ;;  %vm585_vm14 = vcmp.ge.f32.partialorder %v547_v57, 0.0  ;;  %v617_v7 = vmul.f32 0.1, %v547_v57  ;;  %850 = vmatprep.mubr.bf16.mxu0 %v668_v0  ;;  %1050 = vmatprep.mubr.bf16.mxu1 %v670_v1 }
  0xff   : > { %vm584_vm15 = vcmp.ge.f32.partialorder %v476_v2, 0.0  ;;  %v616_v8 = vmul.f32 0.1, %v476_v2  ;;  %vm586_vm1 = vcmp.ge.f32.partialorder %v549_v3, 0.0  ;;  %v618_v9 = vmul.f32 0.1, %v549_v3  ;;  %851 = vmatmul.mubr.bf16.vlgmr.msra.gmra.mrb[16].mxu0 %v667_v40  ;;  %1051 = vmatmul.mubr.bf16.vlgmr.msra.gmra.mrb[16].mxu1 %v669_v41 }
 0x100   : > { %v479_v12 = vpop.f32.mrb[8].mxu0  ;;  %v552_v13 = vpop.f32.mrb[8].mxu1  ;;  %v643_v16 = vsel %vm579_vm9, %v470_v42, %v611_v52  ;;  %v647_v17 = vsel %vm583_vm13, %v474_v56, %v615_v6  ;;  %v645_v18 = vsel %vm581_vm10, %v543_v43, %v613_v53  ;;  %v649_v19 = vsel %vm585_vm14, %v547_v57, %v617_v7 }
 0x101   : > { %v480_v20 = vadd.f32 %v479_v12, %v1787_v60  ;;  %v1819_v21 = vadd.f32 %v552_v13, %v1789_v61  ;;  %v481_v22 = vpop.f32.mrb[9].mxu0  ;;  %v554_v23 = vpop.f32.mrb[9].mxu1  ;;  %v648_v24 = vsel %vm584_vm15, %v476_v2, %v616_v8  ;;  %v650_v27 = vsel %vm586_vm1, %v549_v3, %v618_v9 }
 0x102   : > { %v482_v28 = vadd.f32 %v481_v22, %v1791_v62  ;;  %v555_v29 = vadd.f32 %v554_v23, %v1793_v63  ;;  %v483_v30 = vpop.f32.mrb[10].mxu0  ;;  %v556_v31 = vpop.f32.mrb[10].mxu1  ;;  %v672_v32 = vpack.c.bf16 %v648_v24, %v644_v4  ;;  %v674_v33 = vpack.c.bf16 %v650_v27, %v646_v5 }
 0x103   : > { %vm587_vm2 = vcmp.ge.f32.partialorder %v480_v20, 0.0  ;;  %v619_v34 = vmul.f32 0.1, %v480_v20  ;;  %vm589_vm3 = vcmp.ge.f32.partialorder %v1819_v21, 0.0  ;;  %v621_v35 = vmul.f32 0.1, %v1819_v21 }
 0x104   : > { %vm588_vm4 = vcmp.ge.f32.partialorder %v482_v28, 0.0  ;;  %v620_v38 = vmul.f32 0.1, %v482_v28  ;;  %vm590_vm5 = vcmp.ge.f32.partialorder %v555_v29, 0.0  ;;  %v622_v39 = vmul.f32 0.1, %v555_v29  ;;  %858 = vmatprep.mubr.bf16.mxu0 %v672_v32  ;;  %1058 = vmatprep.mubr.bf16.mxu1 %v674_v33 }
 0x105   : > { %v484_v40 = vadd.f32 %v483_v30, %v1787_v60  ;;  %v1828_v41 = vadd.f32 %v556_v31, %v1789_v61  ;;  %v485_v42 = vpop.f32.mrb[11].mxu0  ;;  %v558_v43 = vpop.f32.mrb[11].mxu1  ;;  %v671_v44 = vpack.c.bf16 %v647_v17, %v643_v16  ;;  %v673_v45 = vpack.c.bf16 %v649_v19, %v645_v18 }
 0x106   : > { %v486_v46 = vadd.f32 %v485_v42, %v1791_v62  ;;  %v559_v47 = vadd.f32 %v558_v43, %v1793_v63  ;;  %v489_v48 = vpop.f32.mrb[12].mxu0  ;;  %v562_v49 = vpop.f32.mrb[12].mxu1  ;;  %v652_v50 = vsel %vm588_vm4, %v482_v28, %v620_v38  ;;  %v654_v51 = vsel %vm590_vm5, %v555_v29, %v622_v39 }
 0x107   : > { %vm591_vm6 = vcmp.ge.f32.partialorder %v484_v40, 0.0  ;;  %v623_v52 = vmul.f32 0.1, %v484_v40  ;;  %vm593_vm7 = vcmp.ge.f32.partialorder %v1828_v41, 0.0  ;;  %v625_v53 = vmul.f32 0.1, %v1828_v41  ;;  %859 = vmatmul.mubr.bf16.gmra.mrb[20].mxu0 %v671_v44  ;;  %1059 = vmatmul.mubr.bf16.gmra.mrb[20].mxu1 %v673_v45 }
 0x108   : > { %vm592_vm8 = vcmp.ge.f32.partialorder %v486_v46, 0.0  ;;  %v624_v54 = vmul.f32 0.1, %v486_v46  ;;  %vm594_vm9 = vcmp.ge.f32.partialorder %v559_v47, 0.0  ;;  %v626_v55 = vmul.f32 0.1, %v559_v47 }
 0x109   : > { %v490_v56 = vadd.f32 %v489_v48, %v1787_v60  ;;  %v563_v57 = vadd.f32 %v562_v49, %v1789_v61  ;;  %v491_v58 = vpop.f32.mrb[13].mxu0  ;;  %v564_v59 = vpop.f32.mrb[13].mxu1  ;;  %v651_v0 = vsel %vm587_vm2, %v480_v20, %v619_v34  ;;  %v655_v1 = vsel %vm591_vm6, %v484_v40, %v623_v52 }
 0x10a   : > { %v492_v2 = vadd.f32 %v491_v58, %v1791_v62  ;;  %v565_v3 = vadd.f32 %v564_v59, %v1793_v63  ;;  %v493_v4 = vpop.f32.mrb[14].mxu0  ;;  %v566_v5 = vpop.f32.mrb[14].mxu1  ;;  %v656_v6 = vsel %vm592_vm8, %v486_v46, %v624_v54  ;;  %v658_v7 = vsel %vm594_vm9, %v559_v47, %v626_v55  ;;  %v1859_v46 = vld [vmem:[%s1947_s5] ss:$0 sm:$0xff] }
 0x10b   : > { %vm595_vm10 = vcmp.ge.f32.partialorder %v490_v56, 0.0  ;;  %v627_v8 = vmul.f32 0.1, %v490_v56  ;;  %vm597_vm11 = vcmp.ge.f32.partialorder %v563_v57, 0.0  ;;  %v629_v9 = vmul.f32 0.1, %v563_v57 }
 0x10c   : > { %vm596_vm12 = vcmp.ge.f32.partialorder %v492_v2, 0.0  ;;  %v628_v12 = vmul.f32 0.1, %v492_v2  ;;  %vm598_vm13 = vcmp.ge.f32.partialorder %v565_v3, 0.0  ;;  %v630_v13 = vmul.f32 0.1, %v565_v3 }
 0x10d   : > { %v494_v16 = vadd.f32 %v493_v4, %v1787_v60  ;;  %v567_v17 = vadd.f32 %v566_v5, %v1789_v61  ;;  %v495_v18 = vpop.f32.mrb[15].mxu0  ;;  %v568_v19 = vpop.f32.mrb[15].mxu1  ;;  %v676_v20 = vpack.c.bf16 %v656_v6, %v652_v50  ;;  %v678_v22 = vpack.c.bf16 %v658_v7, %v654_v51 }
 0x10e   : > { %v496_v23 = vadd.f32 %v495_v18, %v1791_v62  ;;  %v569_v24 = vadd.f32 %v568_v19, %v1793_v63  ;;  %v675_v27 = vpack.c.bf16 %v655_v1, %v651_v0  ;;  %v653_v28 = vsel %vm589_vm3, %v1819_v21, %v621_v35  ;;  %v1262_v18 = vld [vmem:[%s1949_s7] ss:$0 sm:$0xff] }
 0x10f   : > { %vm599_vm14 = vcmp.ge.f32.partialorder %v494_v16, 0.0  ;;  %v631_v29 = vmul.f32 0.1, %v494_v16  ;;  %vm601_vm15 = vcmp.ge.f32.partialorder %v567_v17, 0.0  ;;  %v633_v30 = vmul.f32 0.1, %v567_v17  ;;  %866 = vmatprep.mubr.bf16.mxu0 %v676_v20  ;;  %1066 = vmatprep.mubr.bf16.mxu1 %v678_v22 }
 0x110   : > { %vm600_vm1 = vcmp.ge.f32.partialorder %v496_v23, 0.0  ;;  %v632_v60 = vmul.f32 0.1, %v496_v23  ;;  %vm602_vm2 = vcmp.ge.f32.partialorder %v569_v24, 0.0  ;;  %v634_v61 = vmul.f32 0.1, %v569_v24  ;;  %867 = vmatmul.mubr.bf16.gmra.mrb[24].mxu0 %v675_v27 }
 0x111   : > { %v657_v62 = vsel %vm593_vm7, %v1828_v41, %v625_v53  ;;  %v660_v63 = vsel %vm596_vm12, %v492_v2, %v628_v12  ;;  %v662_v31 = vsel %vm598_vm13, %v565_v3, %v630_v13  ;;  %v659_v21 = vsel %vm595_vm10, %v490_v56, %v627_v8 }
 0x112   : > { %v677_v32 = vpack.c.bf16 %v657_v62, %v653_v28  ;;  %v664_v33 = vsel %vm600_vm1, %v496_v23, %v632_v60  ;;  %v666_v34 = vsel %vm602_vm2, %v569_v24, %v634_v61  ;;  %v663_v35 = vsel %vm599_vm14, %v494_v16, %v631_v29 }
 0x113   : > { %v680_v38 = vpack.c.bf16 %v664_v33, %v660_v63  ;;  %v682_v39 = vpack.c.bf16 %v666_v34, %v662_v31  ;;  %v679_v40 = vpack.c.bf16 %v663_v35, %v659_v21  ;;  %v661_v42 = vsel %vm597_vm11, %v563_v57, %v629_v9 }
 0x114   : > { %1067 = vmatmul.mubr.bf16.gmra.mrb[24].mxu1 %v677_v32  ;;  %v665_v43 = vsel %vm601_vm15, %v567_v17, %v633_v30  ;;  %vm1123_vm3 = vcmask 523264  }
 0x115   : > { %874 = vmatprep.mubr.bf16.mxu0 %v680_v38  ;;  %1074 = vmatprep.mubr.bf16.mxu1 %v682_v39  ;;  %v681_v41 = vpack.c.bf16 %v665_v43, %v661_v42 }
 0x118   : > { %875 = vmatmul.mubr.bf16.gmra.mrb[28].mxu0 %v679_v40 }
 0x11c   : > { %1075 = vmatmul.mubr.bf16.gmra.mrb[28].mxu1 %v681_v41 }
 0x1d2   : > { %v1301_v44 = vpop.f32.mrb[16].mxu0  ;;  %v1341_v45 = vpop.f32.mrb[16].mxu1 }
 0x1d3   : > { %v1302_v47 = vpop.f32.mrb[17].mxu0  ;;  %v1342_v48 = vpop.f32.mrb[17].mxu1 }
 0x1d4   : > { %v1303_v49 = vadd.f32 %v1302_v47, %v1301_v44  ;;  %v1304_v50 = vpop.f32.mrb[18].mxu0  ;;  %v1343_v51 = vadd.f32 %v1342_v48, %v1341_v45  ;;  %v1344_v52 = vpop.f32.mrb[18].mxu1 }
 0x1d5   : > { %v1305_v53 = vpop.f32.mrb[19].mxu0  ;;  %v1345_v54 = vpop.f32.mrb[19].mxu1 }
 0x1d6   : > { %v853_v55 = vadd.f32 %v1303_v49, %v1859_v46  ;;  %v1306_v56 = vadd.f32 %v1305_v53, %v1304_v50  ;;  %v1346_v57 = vadd.f32 %v1345_v54, %v1344_v52  ;;  %v1053_v24 = vadd.f32 %v1343_v51, %v1262_v18 }
 0x1d8   : > { %v856_v58 = vadd.f32 %v1306_v56, %v1859_v46  ;;  %v1056_v60 = vadd.f32 %v1346_v57, %v1262_v18 }
 0x1da   : > { %v1307_v59 = vpop.f32.mrb[20].mxu0  ;;  %v1347_v0 = vpop.f32.mrb[20].mxu1 }
 0x1db   : > { %v1308_v1 = vpop.f32.mrb[21].mxu0  ;;  %v1348_v2 = vpop.f32.mrb[21].mxu1 }
 0x1dc   : > { %v1309_v3 = vadd.f32 %v1308_v1, %v1307_v59  ;;  %v1310_v4 = vpop.f32.mrb[22].mxu0  ;;  %v1349_v5 = vadd.f32 %v1348_v2, %v1347_v0  ;;  %v1350_v6 = vpop.f32.mrb[22].mxu1 }
 0x1dd   : > { %v1311_v7 = vpop.f32.mrb[23].mxu0  ;;  %v1351_v8 = vpop.f32.mrb[23].mxu1 }
 0x1de   : > { %v861_v9 = vadd.f32 %v1309_v3, %v1859_v46  ;;  %v1312_v12 = vadd.f32 %v1311_v7, %v1310_v4  ;;  %v1352_v13 = vadd.f32 %v1351_v8, %v1350_v6  ;;  %v1061_v48 = vadd.f32 %v1349_v5, %v1262_v18 }
 0x1e0   : > { %v864_v16 = vadd.f32 %v1312_v12, %v1859_v46  ;;  %v1064_v53 = vadd.f32 %v1352_v13, %v1262_v18 }
 0x1e3   : > { %v1313_v17 = vpop.f32.mrb[24].mxu0 }
 0x1e4   : > { %v1314_v19 = vpop.f32.mrb[25].mxu0 }
 0x1e5   : > { %v1315_v20 = vadd.f32 %v1314_v19, %v1313_v17  ;;  %v1316_v22 = vpop.f32.mrb[26].mxu0 }
 0x1e6   : > { %v1317_v23 = vpop.f32.mrb[27].mxu0 }
 0x1e7   : > { %v1353_v27 = vpop.f32.mrb[24].mxu1  ;;  %v869_v28 = vadd.f32 %v1315_v20, %v1859_v46  ;;  %v1318_v29 = vadd.f32 %v1317_v23, %v1316_v22 }
 0x1e8   : > { %v1354_v30 = vpop.f32.mrb[25].mxu1 }
 0x1e9   : > { %v1087_v61 = vadd.f32 %v1053_v24, %v869_v28  ;;  %v1355_v62 = vadd.f32 %v1354_v30, %v1353_v27  ;;  %v1356_v63 = vpop.f32.mrb[26].mxu1  ;;  %v872_v31 = vadd.f32 %v1318_v29, %v1859_v46 }
 0x1ea   : > { %v1357_v21 = vpop.f32.mrb[27].mxu1 }
 0x1eb   : > { %v1069_v32 = vadd.f32 %v1355_v62, %v1262_v18  ;;  %v1088_v33 = vadd.f32 %v1056_v60, %v872_v31  ;;  %v1358_v34 = vadd.f32 %v1357_v21, %v1356_v63  ;;  %v1319_v35 = vpop.f32.mrb[28].mxu0  ;;  %v1099_v38 = vadd.f32 %v1087_v61, %v1696_v25 }
 0x1ec   : > { %v1320_v39 = vpop.f32.mrb[29].mxu0 }
 0x1ed   : > { %v1083_v40 = vsub.f32 %v853_v55, %v1069_v32  ;;  %v1072_v42 = vadd.f32 %v1358_v34, %v1262_v18  ;;  %v1321_v43 = vadd.f32 %v1320_v39, %v1319_v35  ;;  %v1322_v41 = vpop.f32.mrb[30].mxu0  ;;  %v1103_v44 = vsel %vm412_vm0, %v1099_v38, %v1087_v61 }
 0x1ee   : > { %v1323_v45 = vpop.f32.mrb[31].mxu0  ;;  %1111 = vrot.lane.b32.xlu0 %v1103_v44, %s1517_s24  ;;  %v1100_v47 = vadd.f32 %v1088_v33, %v1698_v26 }
 0x1ef   : > { %v1084_v49 = vsub.f32 %v856_v58, %v1072_v42  ;;  %v1359_v50 = vpop.f32.mrb[28].mxu1  ;;  %v877_v51 = vadd.f32 %v1321_v43, %v1859_v46  ;;  %v1324_v52 = vadd.f32 %v1323_v45, %v1322_v41  ;;  %v1091_v8 = vadd.f32 %v1083_v40, %v1650_v10 }
 0x1f0   : > { %v1360_v25 = vpop.f32.mrb[29].mxu1  ;;  %v1104_v59 = vsel %vm412_vm0, %v1100_v47, %v1088_v33 }
 0x1f1   : > { %v1089_v54 = vadd.f32 %v1061_v48, %v877_v51  ;;  %v1361_v55 = vadd.f32 %v1360_v25, %v1359_v50  ;;  %v1362_v56 = vpop.f32.mrb[30].mxu1  ;;  %v880_v57 = vadd.f32 %v1324_v52, %v1859_v46  ;;  %v1092_v12 = vadd.f32 %v1084_v49, %v1652_v11 }
 0x1f2   : > { %v1363_v0 = vpop.f32.mrb[31].mxu1  ;;  %1113 = vrot.lane.b32.xlu0 %v1104_v59, %s1517_s24 }
 0x1f3   : > { %v1077_v1 = vadd.f32 %v1361_v55, %v1262_v18  ;;  %v1090_v26 = vadd.f32 %v1064_v53, %v880_v57  ;;  %v1364_v2 = vadd.f32 %v1363_v0, %v1362_v56  ;;  %v1101_v58 = vadd.f32 %v1089_v54, %v1730_v36 }
 0x1f4   : > { %v1096_v17 = vsel %vm412_vm0, %v1092_v12, %v1084_v49 }
 0x1f5   : > { %v1085_v3 = vsub.f32 %v861_v9, %v1077_v1  ;;  %v1080_v4 = vadd.f32 %v1364_v2, %v1262_v18  ;;  %v1105_v5 = vsel %vm412_vm0, %v1101_v58, %v1089_v54  ;;  %v1102_v6 = vadd.f32 %v1090_v26, %v1732_v37 }
 0x1f6   : > { %1115 = vrot.lane.b32.xlu1 %v1105_v5, %s1517_s24  ;;  %v1095_v9 = vsel %vm412_vm0, %v1091_v8, %v1083_v40 }
 0x1f7   : > { %v1086_v7 = vsub.f32 %v864_v16, %v1080_v4  ;;  %v1106_v46 = vsel %vm412_vm0, %v1102_v6, %v1090_v26  ;;  %v1093_v37 = vadd.f32 %v1085_v3, %v1659_v14 }
 0x1f9   : > { %v1094_v10 = vadd.f32 %v1086_v7, %v1661_v15  ;;  %v1097_v19 = vsel %vm412_vm0, %v1093_v37, %v1085_v3 }
 0x1fa   : > { %1117 = vrot.lane.b32.xlu1 %v1106_v46, %s1517_s24 }
 0x1fb   : > { %v1098_v22 = vsel %vm412_vm0, %v1094_v10, %v1086_v7 }
 0x260   : > { %v1112_v36 = vpop.permute.xlu0 %1111 }
 0x261   : > { %v1124_v13 = vsel %vm1123_vm3, %v1095_v9, %v1112_v36 }
 0x262   : > { %1128 = vst [vmem:[%s315_s26] sm:$0xff] %v1124_v13 }
 0x264   : > { %v1114_v16 = vpop.permute.xlu0 %1113 }
 0x265   : > { %v1125_v18 = vsel %vm1123_vm3, %v1096_v17, %v1114_v16 }
 0x266   : > { %1129 = vst [vmem:[%s315_s26 + $0x8] sm:$0xff] %v1125_v18 }
 0x268   : > { %v1116_v11 = vpop.permute.xlu1 %1115 }
 0x269   : > { %v1126_v20 = vsel %vm1123_vm3, %v1097_v19, %v1116_v11 }
 0x26a   : > { %1130 = vst [vmem:[%s315_s26 + $0x10] sm:$0xff] %v1126_v20 }
 0x26c   : > { %v1118_v14 = vpop.permute.xlu1 %1117 }
 0x26d   : > { %v1127_v15 = vsel %vm1123_vm3, %v1098_v22, %v1118_v14 }
 0x26e   : > { %1131 = vst [vmem:[%s315_s26 + $0x18] sm:$0xff] %v1127_v15 }
 0x26f   : > { %1465 = shalt.err (!%p1462_p3)
}
 0x270   : > { %s1466_s24 = scalar_lea.hbm %s1898_s18, 512  ;;  %s1470_s26 = scalar_lea.hbm %s1950_s8, 1024 }
 0x271   : > { %p1467_p4 = scmp.ne.s32.totalorder %s1898_s18, %s1466_s24  ;;  %p1471_p9 = scmp.lt.u32.totalorder %s1898_s18, %s1950_s8 }
 0x272   : > { %p1472_p10 = scmp.lt.u32.totalorder %s1470_s26, %s1466_s24  ;;  %p1474_p12 = scmp.lt.u32.totalorder %s1466_s24, %s1898_s18 }
 0x273   : > { %p1468_p7 = pnand %p1467_p4, %p1604_p5 }
 0x274   : > { %p1473_p11 = por %p1472_p10, %p1471_p9 }
 0x275   : > { %p1469_p8 = pneg %p1468_p7 }
 0x276   : > { %p1475_p13 = por %p1474_p12, %p1473_p11 }
 0x278   : > { %p1476_p0 = pnand %p1475_p13, %p1469_p8 }
 0x27a   : > { %1479 = shalt.err (!%p1476_p0)
}
 0x27b   : > { %s1519_s17 = smov 128   ;;  %s1520_s9 = smov 8  }
 0x27c   : > { %1365 = dma.vmem_to_hbm [thread:$0]  (%p1604_p5), %s1892_s10, 512, %s1898_s18, %s1901_s13, %s1519_s17, %s1519_s17, %s1520_s9  }
 0x27d PF: > { %p1371_p1 = scmp.ge.s32.totalorder %s1514_s30, 2  ;;  %s1161_s20 = sand.u32 1, %s1502_s27  }
 0x27e   : > { %s1162_s21 = scalar_lea.sflag [#allocation3], %s1161_s20 }
 0x27f   : > { %p1368_p2 = pnand %p1371_p1, %p1608_p6 }
 0x281   : > { %1497 = dma.done.wait (!%p1368_p2), %s1162_s21, 512  }
 0x282   : > { %1499 = vsyncadd (!%p1368_p2), %s1162_s21, 4294966784  ;;  %p18_p3 = scmp.ge.s32.totalorder %s1591_s11, 4   ;;  %s1953_s27 = smov %s1506_s28 }
 0x283   : > { %s1954_s28 = smov %s1510_s29  ;;  %s1955_s29 = smov %s1602_s14 }
 0x284   : > { %s1956_s30 = smov %s1591_s11  ;;  %20 = sbr.rel (!%p18_p3) target bundleno = 3 (0x3), region = 90 }
 0x28b   :  { %1167 = vsyncpa [#allocation3], 1 }
 0x28c   :  { %1169 = vsyncpa [#allocation3 + $0x1], 1 }

</bundles_post_ra>
